<compile_context>
chip_gen: v7x
topology: tpu7x:2x2x1
jax: 0.10.0
libtpu: 0.0.40
codegen_flags: <defaults>
</compile_context>

<pallas_src>
import functools
import math

import jax
import jax.numpy as jnp
from jax.experimental import pallas as pl
from jax.experimental.pallas import tpu as pltpu


def _round_up(x, m):
    return (x + m - 1) // m * m


def _device_info():
    """Returns (base_tile_m, is_v7x) from the current TPU generation."""
    try:
        kind = jax.devices()[0].device_kind.lower()
    except Exception:
        kind = ""
    is_v7 = "v7" in kind
    if any(g in kind for g in ("v2", "v3", "v4", "v5")):
        base = 512          # 128 MiB VMEM: big row tiles amortize per-step overhead
    elif "v6" in kind:
        base = 512          # same reasoning; N of the 2nd matmul is only ~128
    else:
        base = 256          # v7x / unknown: 64 MiB physical VMEM, stay conservative
    return base, is_v7


def _pick_tile_m(n_rows, base, is_v7x):
    """Rows per grid step, capped to the workload; on v7x prefer >=2 (even) steps."""
    tile = min(base, max(128, _round_up(n_rows, 128)))
    if is_v7x and n_rows > 128:
        # 2 TensorCores per chip: make sure both get grid steps.
        while tile > 128 and pl.cdiv(n_rows, tile) < 2:
            tile //= 2
        nt = pl.cdiv(n_rows, tile)
        if (nt > 1 and nt % 2 == 1 and tile > 128
                and pl.cdiv(n_rows, tile // 2) % 2 == 0):
            tile //= 2
    return tile


def _vmem_limit_bytes(tile_m, d, hp, lp, k_rows, is_v7x):
    """Explicit VMEM budget: single-buffered weights + double-buffered per-step
    blocks + in-flight intermediates, with headroom."""
    bf2, f4 = 2, 4
    weights = (k_rows * d) * bf2 + d * hp * bf2 + hp * f4 + hp * lp * bf2 + lp * f4
    per_step = 2 * (2 * tile_m * f4 + tile_m * f4 + tile_m * f4)  # ids, mask, tag (x2 bufs)
    work = tile_m * (k_rows * bf2 + d * f4 + hp * f4 + 2 * lp * f4)
    limit = weights + per_step + 2 * work + (4 << 20)
    cap = (64 << 20) if is_v7x else (128 << 20)
    return int(min(cap, max(16 << 20, limit)))


def _seqmodel_kernel(wid_ref, fid_ref, table_ref, w1_ref, b1_ref, w2_ref, b2_ref,
                     mask_ref, tag_ref, *, num_labels, word_rows):
    tm = tag_ref.shape[2]
    kdim = table_ref.shape[0]               # word rows + feature rows (padded)

    # ---- fused embedding gather: ONE one-hot bf16 matmul on the MXU ---------
    # ids arrive as (TM, 1) so rows already sit on sublanes (no relayout).
    # TODO(synk): for production-size vocabularies replace the one-hot matmul
    #             with a scalar-prefetch + make_async_copy row gather from HBM.
    wid = wid_ref[0]                                                 # (TM, 1) i32
    fid = fid_ref[0]                                                 # (TM, 1) i32
    lane_k = jax.lax.broadcasted_iota(jnp.int32, (tm, kdim), 1)
    oh = ((lane_k == wid) | (lane_k == (fid + word_rows))).astype(jnp.bfloat16)
    emb = jnp.dot(oh, table_ref[...], preferred_element_type=jnp.float32)  # (TM, D) f32

    # ---- word feature extractor: tanh(emb @ W1 + b1)  (hot matmul #1) -------
    # tanh kept in f32 for parity (and v5e has no bf16 EUP/VALU).
    h = jnp.tanh(
        jnp.dot(emb.astype(jnp.bfloat16), w1_ref[...],
                preferred_element_type=jnp.float32) + b1_ref[...])   # (TM, Hp) f32

    # ---- hidden2tag: h @ W2 + b2  (hot matmul #2) ----------------------------
    outs = (jnp.dot(h.astype(jnp.bfloat16), w2_ref[...],
                    preferred_element_type=jnp.float32) + b2_ref[...])  # (TM, Lp) f32

    # ---- first-occurrence argmax over the real (unpadded) label columns -----
    lp = outs.shape[1]
    lane = jax.lax.broadcasted_iota(jnp.int32, outs.shape, 1)
    if num_labels < lp:                       # statically skipped when L % 128 == 0
        outs = jnp.where(lane < num_labels, outs, -jnp.inf)
    max_val = jnp.max(outs, axis=1, keepdims=True)          # (TM, 1)
    cand = jnp.where(outs == max_val, lane, lp)
    tag = jnp.minimum(jnp.min(cand, axis=1), num_labels - 1)  # NaN-safe clamp
    tag = tag.astype(jnp.int32)                                # (TM,)

    # mask.long() * tag_seq ; lane-dense (1, 1, TM) store
    tag_ref[...] = (tag * mask_ref[0, 0, :]).reshape(1, 1, -1)


def seqmodel_forward(word_inputs, feature_inputs, word_seq_lengths,
                     char_inputs, char_seq_lengths, char_seq_recover,
                     mask, params, *, tile_m=None):
    """Non-CRF forward of SeqModel. char_* / word_seq_lengths are accepted for
    signature parity but unused (no char feature extractor)."""
    del word_seq_lengths, char_inputs, char_seq_lengths, char_seq_recover

    base_tile, is_v7x = _device_info()

    B, S = word_inputs.shape
    N = B * S
    if tile_m is None:
        tile_m = _pick_tile_m(N, base_tile, is_v7x)
    num_tiles = pl.cdiv(N, tile_m)
    n_pad = num_tiles * tile_m

    def pad_flat(x):
        x = x.reshape(N)
        return jnp.pad(x, (0, n_pad - N))

    # Flatten B*S into row tiles; ids fed column-major (rows on sublanes),
    # mask/tag lane-dense.  Last two dims of every block equal the array dims.
    wid = pad_flat(word_inputs.astype(jnp.int32)).reshape(num_tiles, tile_m, 1)
    fid = pad_flat(feature_inputs.astype(jnp.int32)).reshape(num_tiles, tile_m, 1)
    mask_t = pad_flat(mask.astype(jnp.int32)).reshape(num_tiles, 1, tile_m)

    # Pad H/L to lane multiples (128) and vocab (sublane) dims to 16 for bf16
    # packing.  Zero-padded hidden units contribute exactly zero; padded label
    # columns are masked to -inf inside the kernel (only when L % 128 != 0).
    D = params["word_emb"].shape[1]
    H = params["w1"].shape[1]
    L = params["w2"].shape[1]
    V = params["word_emb"].shape[0]
    FV = params["feat_emb"].shape[0]
    Hp = _round_up(H, 128)
    Lp = _round_up(L, 128)
    Vp = _round_up(V, 16)
    FVp = _round_up(FV, 16)
    K_rows = Vp + FVp

    # Stacked embedding table: word rows [0, Vp), feature rows [Vp, Vp+FVp).
    table = jnp.concatenate(
        [jnp.pad(params["word_emb"], ((0, Vp - V), (0, 0))),
         jnp.pad(params["feat_emb"], ((0, FVp - FV), (0, 0)))],
        axis=0).astype(jnp.bfloat16)
    w1 = jnp.pad(params["w1"], ((0, 0), (0, Hp - H))).astype(jnp.bfloat16)
    b1 = jnp.pad(params["b1"], ((0, 0), (0, Hp - H))).astype(jnp.float32)
    w2 = jnp.pad(params["w2"], ((0, Hp - H), (0, Lp - L))).astype(jnp.bfloat16)
    b2 = jnp.pad(params["b2"], ((0, 0), (0, Lp - L))).astype(jnp.float32)

    kernel = functools.partial(_seqmodel_kernel, num_labels=L, word_rows=Vp)

    # Constant-index operands: single-buffered (their block never changes).
    const = dict(pipeline_mode=pl.Buffered(1))

    tag = pl.pallas_call(
        kernel,
        out_shape=jax.ShapeDtypeStruct((num_tiles, 1, tile_m), jnp.int32),
        grid_spec=pltpu.PrefetchScalarGridSpec(
            num_scalar_prefetch=0,
            grid=(num_tiles,),
            in_specs=[
                pl.BlockSpec((1, tile_m, 1), lambda i: (i, 0, 0)),   # word ids
                pl.BlockSpec((1, tile_m, 1), lambda i: (i, 0, 0)),   # feature ids
                pl.BlockSpec((K_rows, D), lambda i: (0, 0), **const),  # stacked emb table
                pl.BlockSpec((D, Hp),     lambda i: (0, 0), **const),  # W1
                pl.BlockSpec((1, Hp),     lambda i: (0, 0), **const),  # b1
                pl.BlockSpec((Hp, Lp),    lambda i: (0, 0), **const),  # W2
                pl.BlockSpec((1, Lp),     lambda i: (0, 0), **const),  # b2
                pl.BlockSpec((1, 1, tile_m), lambda i: (i, 0, 0)),   # mask (lane-dense)
            ],
            out_specs=pl.BlockSpec((1, 1, tile_m), lambda i: (i, 0, 0)),  # tags
        ),
        compiler_params=pltpu.CompilerParams(
            dimension_semantics=("parallel",),
            vmem_limit_bytes=_vmem_limit_bytes(tile_m, D, Hp, Lp, K_rows, is_v7x)),
    )(wid, fid, table, w1, b1, w2, b2, mask_t)

    return tag.reshape(n_pad)[:N].reshape(B, S)


def init_params(key, vocab_size, feat_vocab_size, embed_dim, hidden_dim, label_size):
    k = jax.random.split(key, 6)
    s = 0.1
    return {
        "word_emb": s * jax.random.normal(k[0], (vocab_size, embed_dim), jnp.float32),
        "feat_emb": s * jax.random.normal(k[1], (feat_vocab_size, embed_dim), jnp.float32),
        "w1": s * jax.random.normal(k[2], (embed_dim, hidden_dim), jnp.float32),
        "b1": s * jax.random.normal(k[3], (1, hidden_dim), jnp.float32),
        "w2": s * jax.random.normal(k[4], (hidden_dim, label_size), jnp.float32),
        "b2": s * jax.random.normal(k[5], (1, label_size), jnp.float32),
    }


if __name__ == "__main__":
    B, S = 2, 8
    VOCAB, FEAT_VOCAB = 20, 5
    D, H, L = 32, 32, 8  # embed, hidden, label_alphabet_size (+2 as in __init__)

    key = jax.random.PRNGKey(0)
    kp, kw, kf = jax.random.split(key, 3)

    params = init_params(kp, VOCAB, FEAT_VOCAB, D, H, L)

    word_inputs = jax.random.randint(kw, (B, S), 0, VOCAB, dtype=jnp.int32)
    feature_inputs = jax.random.randint(kf, (B, S), 0, FEAT_VOCAB, dtype=jnp.int32)
    word_seq_lengths = jnp.array([S, S - 2], dtype=jnp.int32)
    # mask: 1 for valid positions, 0 for padding
    pos = jnp.arange(S)[None, :]
    mask = (pos < word_seq_lengths[:, None]).astype(jnp.int32)
    # unused char-level inputs (no char feature extractor)
    char_inputs = jnp.zeros((B * S, 4), dtype=jnp.int32)
    char_seq_lengths = jnp.ones((B * S,), dtype=jnp.int32)
    char_seq_recover = jnp.arange(B * S, dtype=jnp.int32)

    tag_seq = seqmodel_forward(word_inputs, feature_inputs, word_seq_lengths,
                               char_inputs, char_seq_lengths, char_seq_recover,
                               mask, params)
    tag_seq = jax.block_until_ready(tag_seq)

    # cross-check against a pure-JAX reference using the same bf16 matmul dtypes
    wemb_bf = params["word_emb"].astype(jnp.bfloat16)
    femb_bf = params["feat_emb"].astype(jnp.bfloat16)
    emb = (wemb_bf[word_inputs].astype(jnp.float32)
           + femb_bf[feature_inputs].astype(jnp.float32)).reshape(-1, D)
    h = jnp.tanh(jnp.dot(emb.astype(jnp.bfloat16),
                         params["w1"].astype(jnp.bfloat16),
                         preferred_element_type=jnp.float32) + params["b1"][0])
    outs = (jnp.dot(h.astype(jnp.bfloat16),
                    params["w2"].astype(jnp.bfloat16),
                    preferred_element_type=jnp.float32) + params["b2"][0])
    ref = jnp.argmax(outs, axis=-1).astype(jnp.int32).reshape(B, S) * mask

    # positions whose top-2 score gap is within numerical noise may legally differ
    top2 = jax.lax.top_k(outs, 2)[0]
    gap = (top2[:, 0] - top2[:, 1]).reshape(B, S)
    agree = (tag_seq == ref) | (gap <= 1e-3)
    assert bool(jnp.all(agree)), (tag_seq, ref)

    print("KERNEL_OK")
</pallas_src>

<mosaic_0001>
module attributes {stable_mosaic.version = 11 : i64} {
  func.func @_seqmodel_kernel(%arg0: i32, %arg1: memref<1x128x1xi32, #tpu.memory_space<vmem>>, %arg2: memref<1x128x1xi32, #tpu.memory_space<vmem>>, %arg3: memref<48x32xbf16, #tpu.memory_space<vmem>>, %arg4: memref<32x128xbf16, #tpu.memory_space<vmem>>, %arg5: memref<1x128xf32, #tpu.memory_space<vmem>>, %arg6: memref<128x128xbf16, #tpu.memory_space<vmem>>, %arg7: memref<1x128xf32, #tpu.memory_space<vmem>>, %arg8: memref<1x1x128xi32, #tpu.memory_space<vmem>>, %arg9: memref<1x1x128xi32, #tpu.memory_space<vmem>>) attributes {dimension_semantics = [#tpu.dimension_semantics<parallel>], iteration_bounds = array<i64: 1>, scalar_prefetch = 0 : i64, scratch_operands = 0 : i64, tpu.core_type = #tpu.core_type<tc>, window_params = [{transform_indices = @transform_0, window_bounds = array<i64: 1, 128, 1>}, {transform_indices = @transform_1, window_bounds = array<i64: 1, 128, 1>}, {pipeline_mode = #tpu.pipeline_mode<synchronous>, transform_indices = @transform_2, window_bounds = array<i64: 48, 32>}, {pipeline_mode = #tpu.pipeline_mode<synchronous>, transform_indices = @transform_3, window_bounds = array<i64: 32, 128>}, {pipeline_mode = #tpu.pipeline_mode<synchronous>, transform_indices = @transform_4, window_bounds = array<i64: 1, 128>}, {pipeline_mode = #tpu.pipeline_mode<synchronous>, transform_indices = @transform_5, window_bounds = array<i64: 128, 128>}, {pipeline_mode = #tpu.pipeline_mode<synchronous>, transform_indices = @transform_6, window_bounds = array<i64: 1, 128>}, {transform_indices = @transform_7, window_bounds = array<i64: 1, 1, 128>}, {transform_indices = @transform_8, window_bounds = array<i64: 1, 1, 128>}]} {
    %c0 = arith.constant 0 : index
    %c0_0 = arith.constant 0 : index
    %c0_1 = arith.constant 0 : index
    %0 = vector.load %arg1[%c0, %c0_0, %c0_1] : memref<1x128x1xi32, #tpu.memory_space<vmem>>, vector<1x128x1xi32>
    %1 = vector.shape_cast %0 : vector<1x128x1xi32> to vector<128x1xi32>
    %c0_2 = arith.constant 0 : index
    %c0_3 = arith.constant 0 : index
    %c0_4 = arith.constant 0 : index
    %2 = vector.load %arg2[%c0_2, %c0_3, %c0_4] : memref<1x128x1xi32, #tpu.memory_space<vmem>>, vector<1x128x1xi32>
    %3 = vector.shape_cast %2 : vector<1x128x1xi32> to vector<128x1xi32>
    %4 = tpu.iota {dimensions = array<i32: 1>} : vector<128x48xi32>
    %5 = vector.broadcast %1 : vector<128x1xi32> to vector<128x48xi32>
    %6 = arith.cmpi eq, %4, %5 : vector<128x48xi32>
    %c32_i32 = arith.constant 32 : i32
    %7 = vector.broadcast %c32_i32 : i32 to vector<128x1xi32>
    %8 = arith.addi %3, %7 : vector<128x1xi32>
    %9 = vector.broadcast %8 : vector<128x1xi32> to vector<128x48xi32>
    %10 = arith.cmpi eq, %4, %9 : vector<128x48xi32>
    %11 = arith.ori %6, %10 : vector<128x48xi1>
    %12 = arith.extui %11 : vector<128x48xi1> to vector<128x48xi32>
    %13 = arith.sitofp %12 : vector<128x48xi32> to vector<128x48xf32>
    %14 = arith.truncf %13 : vector<128x48xf32> to vector<128x48xbf16>
    %c0_5 = arith.constant 0 : index
    %c0_6 = arith.constant 0 : index
    %15 = vector.load %arg3[%c0_5, %c0_6] : memref<48x32xbf16, #tpu.memory_space<vmem>>, vector<48x32xbf16>
    %cst = arith.constant dense<0.000000e+00> : vector<128x32xf32>
    %16 = tpu.matmul %14, %15, %cst {dimension_numbers = #tpu.dot_dimension_numbers<[1], [0], [0], [1], [0, 0, 1, 1], [], []>} : vector<128x48xbf16>, vector<48x32xbf16>, vector<128x32xf32> -> vector<128x32xf32>
    %17 = arith.truncf %16 : vector<128x32xf32> to vector<128x32xbf16>
    %c0_7 = arith.constant 0 : index
    %c0_8 = arith.constant 0 : index
    %18 = vector.load %arg4[%c0_7, %c0_8] : memref<32x128xbf16, #tpu.memory_space<vmem>>, vector<32x128xbf16>
    %cst_9 = arith.constant dense<0.000000e+00> : vector<128x128xf32>
    %19 = tpu.matmul %17, %18, %cst_9 {dimension_numbers = #tpu.dot_dimension_numbers<[1], [0], [0], [1], [0, 0, 1, 1], [], []>} : vector<128x32xbf16>, vector<32x128xbf16>, vector<128x128xf32> -> vector<128x128xf32>
    %c0_10 = arith.constant 0 : index
    %c0_11 = arith.constant 0 : index
    %20 = vector.load %arg5[%c0_10, %c0_11] : memref<1x128xf32, #tpu.memory_space<vmem>>, vector<1x128xf32>
    %21 = vector.broadcast %20 : vector<1x128xf32> to vector<128x128xf32>
    %22 = arith.addf %19, %21 : vector<128x128xf32>
    %23 = math.tanh %22 : vector<128x128xf32>
    %24 = arith.truncf %23 : vector<128x128xf32> to vector<128x128xbf16>
    %c0_12 = arith.constant 0 : index
    %c0_13 = arith.constant 0 : index
    %25 = vector.load %arg6[%c0_12, %c0_13] : memref<128x128xbf16, #tpu.memory_space<vmem>>, vector<128x128xbf16>
    %cst_14 = arith.constant dense<0.000000e+00> : vector<128x128xf32>
    %26 = tpu.matmul %24, %25, %cst_14 {dimension_numbers = #tpu.dot_dimension_numbers<[1], [0], [0], [1], [0, 0, 1, 1], [], []>} : vector<128x128xbf16>, vector<128x128xbf16>, vector<128x128xf32> -> vector<128x128xf32>
    %c0_15 = arith.constant 0 : index
    %c0_16 = arith.constant 0 : index
    %27 = vector.load %arg7[%c0_15, %c0_16] : memref<1x128xf32, #tpu.memory_space<vmem>>, vector<1x128xf32>
    %28 = vector.broadcast %27 : vector<1x128xf32> to vector<128x128xf32>
    %29 = arith.addf %26, %28 : vector<128x128xf32>
    %30 = tpu.iota {dimensions = array<i32: 1>} : vector<128x128xi32>
    %c8_i32 = arith.constant 8 : i32
    %31 = vector.broadcast %c8_i32 : i32 to vector<128x128xi32>
    %32 = arith.cmpi slt, %30, %31 : vector<128x128xi32>
    %cst_17 = arith.constant 0xFF800000 : f32
    %33 = vector.broadcast %cst_17 : f32 to vector<128x128xf32>
    %34 = arith.select %32, %29, %33 : vector<128x128xi1>, vector<128x128xf32>
    %cst_18 = arith.constant dense<0xFF800000> : vector<128xf32>
    %35 = vector.multi_reduction <maximumf>, %34, %cst_18 [1] : vector<128x128xf32> to vector<128xf32>
    %36 = vector.shape_cast %35 : vector<128xf32> to vector<128x1xf32>
    %37 = vector.broadcast %36 : vector<128x1xf32> to vector<128x128xf32>
    %38 = arith.cmpf oeq, %34, %37 : vector<128x128xf32>
    %c128_i32 = arith.constant 128 : i32
    %39 = vector.broadcast %c128_i32 : i32 to vector<128x128xi32>
    %40 = arith.select %38, %30, %39 : vector<128x128xi1>, vector<128x128xi32>
    %cst_19 = arith.constant dense<2147483647> : vector<128xi32>
    %41 = vector.multi_reduction <minsi>, %40, %cst_19 [1] : vector<128x128xi32> to vector<128xi32>
    %c7_i32 = arith.constant 7 : i32
    %42 = vector.broadcast %c7_i32 : i32 to vector<128xi32>
    %43 = arith.minsi %41, %42 : vector<128xi32>
    %c0_20 = arith.constant 0 : index
    %c0_21 = arith.constant 0 : index
    %c0_22 = arith.constant 0 : index
    %44 = vector.load %arg8[%c0_20, %c0_21, %c0_22] : memref<1x1x128xi32, #tpu.memory_space<vmem>>, vector<1x1x128xi32>
    %45 = vector.shape_cast %44 : vector<1x1x128xi32> to vector<128xi32>
    %46 = arith.muli %43, %45 : vector<128xi32>
    %47 = vector.shape_cast %46 : vector<128xi32> to vector<1x1x128xi32>
    %c0_23 = arith.constant 0 : index
    %c0_24 = arith.constant 0 : index
    %c0_25 = arith.constant 0 : index
    %48 = vector.load %arg9[%c0_23, %c0_24, %c0_25] : memref<1x1x128xi32, #tpu.memory_space<vmem>>, vector<1x1x128xi32>
    tpu.vector_store %arg9[%c0_23, %c0_24, %c0_25], %47 {strides = array<i32>} : memref<1x1x128xi32, #tpu.memory_space<vmem>>, vector<1x1x128xi32>,
    return
  }
  func.func @transform_0(%arg0: i32) -> (i32, i32, i32) {
    %c0_i32 = arith.constant 0 : i32
    %c0_i32_0 = arith.constant 0 : i32
    %c0_i32_1 = arith.constant 0 : i32
    return %arg0, %c0_i32, %c0_i32_0 : i32, i32, i32
  }
  func.func @transform_1(%arg0: i32) -> (i32, i32, i32) {
    %c0_i32 = arith.constant 0 : i32
    %c0_i32_0 = arith.constant 0 : i32
    %c0_i32_1 = arith.constant 0 : i32
    return %arg0, %c0_i32, %c0_i32_0 : i32, i32, i32
  }
  func.func @transform_2(%arg0: i32) -> (i32, i32) {
    %c0_i32 = arith.constant 0 : i32
    %c0_i32_0 = arith.constant 0 : i32
    %c0_i32_1 = arith.constant 0 : i32
    return %c0_i32, %c0_i32_0 : i32, i32
  }
  func.func @transform_3(%arg0: i32) -> (i32, i32) {
    %c0_i32 = arith.constant 0 : i32
    %c0_i32_0 = arith.constant 0 : i32
    %c0_i32_1 = arith.constant 0 : i32
    return %c0_i32, %c0_i32_0 : i32, i32
  }
  func.func @transform_4(%arg0: i32) -> (i32, i32) {
    %c0_i32 = arith.constant 0 : i32
    %c0_i32_0 = arith.constant 0 : i32
    %c0_i32_1 = arith.constant 0 : i32
    return %c0_i32, %c0_i32_0 : i32, i32
  }
  func.func @transform_5(%arg0: i32) -> (i32, i32) {
    %c0_i32 = arith.constant 0 : i32
    %c0_i32_0 = arith.constant 0 : i32
    %c0_i32_1 = arith.constant 0 : i32
    return %c0_i32, %c0_i32_0 : i32, i32
  }
  func.func @transform_6(%arg0: i32) -> (i32, i32) {
    %c0_i32 = arith.constant 0 : i32
    %c0_i32_0 = arith.constant 0 : i32
    %c0_i32_1 = arith.constant 0 : i32
    return %c0_i32, %c0_i32_0 : i32, i32
  }
  func.func @transform_7(%arg0: i32) -> (i32, i32, i32) {
    %c0_i32 = arith.constant 0 : i32
    %c0_i32_0 = arith.constant 0 : i32
    %c0_i32_1 = arith.constant 0 : i32
    return %arg0, %c0_i32, %c0_i32_0 : i32, i32, i32
  }
  func.func @transform_8(%arg0: i32) -> (i32, i32, i32) {
    %c0_i32 = arith.constant 0 : i32
    %c0_i32_0 = arith.constant 0 : i32
    %c0_i32_1 = arith.constant 0 : i32
    return %arg0, %c0_i32, %c0_i32_0 : i32, i32, i32
  }
}

</mosaic_0001>

<bundles_post_ra>
// kernel: tpu_custom_call.1
= control target key start
LH: loop header
LB: loop body
LE: loop exit
PB: predicated region body
PF: predicated region fallthrough
CT: control target
= control target key end

     0   :  { %v1598_v2 = vmov 0   ;;  %s2287_s0 = inlined_call_operand.vmem [shape: s32[1,128,1], index: 0, kind: input, shape index: {}]   ;;  %s2288_s1 = inlined_call_operand.vmem [shape: s32[1,128,1], index: 1, kind: input, shape index: {}]   ;;  %s2289_s2 = inlined_call_operand.vmem [shape: bf16[48,32], index: 2, kind: input, shape index: {}]   ;;  %s2290_s3 = inlined_call_operand.vmem [shape: bf16[32,128], index: 3, kind: input, shape index: {}]   ;;  %s2291_s4 = inlined_call_operand.vmem [shape: f32[1,128], index: 4, kind: input, shape index: {}]   ;;  %s2292_s5 = inlined_call_operand.vmem [shape: bf16[128,128], index: 5, kind: input, shape index: {}]   ;;  %s2293_s6 = inlined_call_operand.vmem [shape: f32[1,128], index: 6, kind: input, shape index: {}]   ;;  %s2294_s7 = inlined_call_operand.vmem [shape: s32[1,1,128], index: 7, kind: input, shape index: {}]   ;;  %s2295_s8 = inlined_call_operand.hbm [shape: s32[1,1,128], index: 8, kind: output, shape index: {}]  }
   0x1   :  { %v31_v0 = vld [vmem:[%s2287_s0] sm:$0xff]  ;;  %1527 = vset.pattern.permute.xlu0 %v1598_v2  ;;  %1528 = vset.pattern.permute.xlu1 %v1598_v2  ;;  %v48_v4 = vld [vmem:[%s2288_s1 + $0x8] sm:$0xff]  ;;  %v33_v7 = vld [vmem:[%s2287_s0 + $0x10] sm:$0xff] }
   0x2   :  { %v47_v1 = vld [vmem:[%s2288_s1] sm:$0xff]  ;;  %66 = vperm.xlu0 %1527, %v31_v0   ;;  %v32_v5 = vld [vmem:[%s2287_s0 + $0x8] sm:$0xff]  ;;  %v130_v6 = vadd.s32 32, %v48_v4  ;;  %v49_v8 = vld [vmem:[%s2288_s1 + $0x10] sm:$0xff] }
   0x3   :  { %v129_v3 = vadd.s32 32, %v47_v1  ;;  %v34_v9 = vld [vmem:[%s2287_s0 + $0x18] sm:$0xff]  ;;  %v51_v11 = vld [vmem:[%s2288_s1 + $0x20] sm:$0xff]  ;;  %v131_v12 = vadd.s32 32, %v49_v8  ;;  %v52_v13 = vld [vmem:[%s2288_s1 + $0x28] sm:$0xff] }
   0x4   :  { %v50_v10 = vld [vmem:[%s2288_s1 + $0x18] sm:$0xff]  ;;  %v1529_v15 = vld [vmem:[%s2289_s2] sm:$0xff]   ;;  %v1530_v16 = vld [vmem:[%s2289_s2 + $0x8] sm:$0xff]   ;;  %v133_v17 = vadd.s32 32, %v51_v11  ;;  %v134_v20 = vadd.s32 32, %v52_v13 }
   0x5   :  { %146 = vperm.xlu1 %1528, %v129_v3   ;;  %v132_v14 = vadd.s32 32, %v50_v10  ;;  %v35_v18 = vld [vmem:[%s2287_s0 + $0x20] sm:$0xff]  ;;  %1434 = vmatprep.subr.bf16.mxu0 %v1529_v15  ;;  %v36_v19 = vld [vmem:[%s2287_s0 + $0x28] sm:$0xff]  ;;  %v1531_v21 = vld [vmem:[%s2289_s2 + $0x10] sm:$0xff]  }
   0x6   :  { %69 = vperm.xlu0 %1527, %v32_v5   ;;  %1435 = vmatpush3.bf16.msra.mxu0 %v1529_v15 }
   0x7   :  { %1436 = vmatprep.subr.bf16.mxu0 %v1530_v16 }
   0x9   :  { %149 = vperm.xlu1 %1528, %v130_v6  }
   0xa   :  { %72 = vperm.xlu0 %1527, %v33_v7   ;;  %1437 = vmatpush3.bf16.msra.mxu0 %v1530_v16 }
   0xb   :  { %1438 = vmatprep.subr.bf16.mxu0 %v1531_v21 }
   0xd   :  { %75 = vperm.xlu1 %1528, %v34_v9  }
   0xe   :  { %152 = vperm.xlu0 %1527, %v131_v12  }
  0x11   :  { %155 = vperm.xlu1 %1528, %v132_v14  }
  0x12   :  { %78 = vperm.xlu0 %1527, %v35_v18  }
  0x15   :  { %81 = vperm.xlu1 %1528, %v36_v19  }
  0x16   :  { %13 = vsyncpa [#allocation3], 0  ;;  %158 = vperm.xlu0 %1527, %v133_v17   ;;  %1439 = vmatpush3.bf16.msra.mxu0 %v1531_v21  ;;  %v37_v22 = vld [vmem:[%s2287_s0 + $0x30] sm:$0xff]  ;;  %v38_v24 = vld [vmem:[%s2287_s0 + $0x38] sm:$0xff]  ;;  %v63_v53 = vlaneseq  ;;  %v1599_v60 = vmov 0.0   ;;  %vm289_vm6 = vcmask 392192  }
  0x17   :  { %v53_v23 = vld [vmem:[%s2288_s1 + $0x30] sm:$0xff]  ;;  %v54_v25 = vld [vmem:[%s2288_s1 + $0x38] sm:$0xff]  ;;  %v39_v28 = vld [vmem:[%s2287_s0 + $0x40] sm:$0xff] }
  0x18   :  { %v135_v26 = vadd.s32 32, %v53_v23  ;;  %v136_v27 = vadd.s32 32, %v54_v25  ;;  %v55_v29 = vld [vmem:[%s2288_s1 + $0x40] sm:$0xff]  ;;  %v40_v30 = vld [vmem:[%s2287_s0 + $0x48] sm:$0xff]  ;;  %v41_v34 = vld [vmem:[%s2287_s0 + $0x50] sm:$0xff]  ;;  %v1755_v54 = vand.u32 127, %v63_v53 }
  0x19   :  { %161 = vperm.xlu1 %1528, %v134_v20   ;;  %v56_v31 = vld [vmem:[%s2288_s1 + $0x48] sm:$0xff]  ;;  %v137_v32 = vadd.s32 32, %v55_v29  ;;  %v57_v35 = vld [vmem:[%s2288_s1 + $0x50] sm:$0xff]  ;;  %v42_v36 = vld [vmem:[%s2287_s0 + $0x58] sm:$0xff] }
  0x1a   :  { %84 = vperm.xlu0 %1527, %v37_v22   ;;  %v138_v33 = vadd.s32 32, %v56_v31  ;;  %v58_v37 = vld [vmem:[%s2288_s1 + $0x58] sm:$0xff]  ;;  %v139_v38 = vadd.s32 32, %v57_v35  ;;  %v43_v40 = vld [vmem:[%s2287_s0 + $0x60] sm:$0xff]  ;;  %v44_v42 = vld [vmem:[%s2287_s0 + $0x68] sm:$0xff] }
  0x1b   :  { %v140_v39 = vadd.s32 32, %v58_v37  ;;  %v59_v41 = vld [vmem:[%s2288_s1 + $0x60] sm:$0xff]  ;;  %v60_v43 = vld [vmem:[%s2288_s1 + $0x68] sm:$0xff]  ;;  %v45_v46 = vld [vmem:[%s2287_s0 + $0x70] sm:$0xff] }
  0x1c   :  { %v141_v44 = vadd.s32 32, %v59_v41  ;;  %v142_v45 = vadd.s32 32, %v60_v43  ;;  %v61_v47 = vld [vmem:[%s2288_s1 + $0x70] sm:$0xff]  ;;  %v46_v48 = vld [vmem:[%s2287_s0 + $0x78] sm:$0xff]  ;;  %v1532_v52 = vld [vmem:[%s2290_s3] sm:$0xff]  }
  0x1d   :  { %87 = vperm.xlu1 %1528, %v38_v24   ;;  %v62_v49 = vld [vmem:[%s2288_s1 + $0x78] sm:$0xff]  ;;  %v143_v50 = vadd.s32 32, %v61_v47  ;;  %1456 = vmatprep.subr.bf16.mxu1 %v1532_v52 }
  0x1e   :  { %164 = vperm.xlu0 %1527, %v135_v26   ;;  %v144_v51 = vadd.s32 32, %v62_v49  ;;  %1457 = vmatpush3.bf16.msra.mxu1 %v1532_v52  ;;  %v1534_v49 = vld [vmem:[%s2292_s5] sm:$0xff]  }
  0x1f   :  { %1476 = vmatprep.subr.bf16.mxu0 %v1534_v49 }
  0x21   :  { %167 = vperm.xlu1 %1528, %v136_v27  }
  0x22   :  { %90 = vperm.xlu0 %1527, %v39_v28  }
  0x25   :  { %93 = vperm.xlu1 %1528, %v40_v30  }
  0x26   :  { %170 = vperm.xlu0 %1527, %v137_v32  }
  0x29   :  { %173 = vperm.xlu1 %1528, %v138_v33  }
  0x2a   :  { %96 = vperm.xlu0 %1527, %v41_v34  }
  0x2d   :  { %99 = vperm.xlu1 %1528, %v42_v36  }
  0x2e   :  { %176 = vperm.xlu0 %1527, %v139_v38  }
  0x31   :  { %179 = vperm.xlu1 %1528, %v140_v39  }
  0x32   :  { %102 = vperm.xlu0 %1527, %v43_v40  }
  0x35   :  { %105 = vperm.xlu1 %1528, %v44_v42  }
  0x36   :  { %182 = vperm.xlu0 %1527, %v141_v44  }
  0x39   :  { %185 = vperm.xlu1 %1528, %v142_v45  }
  0x3a   :  { %108 = vperm.xlu0 %1527, %v45_v46  }
  0x3d   :  { %111 = vperm.xlu1 %1528, %v46_v48   ;;  %v1533_v48 = vld [vmem:[%s2290_s3 + $0x8] sm:$0xff]  }
  0x3e   :  { %188 = vperm.xlu0 %1527, %v143_v50   ;;  %1458 = vmatprep.subr.bf16.mxu1 %v1533_v48  ;;  %v1535_v50 = vld [vmem:[%s2292_s5 + $0x8] sm:$0xff]  }
  0x3f   :  { %1459 = vmatpush3.bf16.msra.mxu1 %v1533_v48 }
  0x40   :  { %1508 = vmatprep.subr.bf16.mxu1 %v1534_v49 }
  0x41   :  { %191 = vperm.xlu1 %1528, %v144_v51   ;;  %v1536_v51 = vld [vmem:[%s2292_s5 + $0x10] sm:$0xff]  }
  0x81   :  { %v67_v55 = vpop.permute.xlu0 %66 }
  0x82   :  { %vm113_vm0 = vcmp.eq.s32.totalorder %v1755_v54, %v67_v55 }
  0x84   :  { %v147_v56 = vpop.permute.xlu1 %146 }
  0x85   :  { %vm193_vm1 = vcmp.eq.s32.totalorder %v1755_v54, %v147_v56  ;;  %v70_v57 = vpop.permute.xlu0 %69 }
  0x86   :  { %vm209_vm2 = vmor %vm113_vm0, %vm193_vm1  ;;  %vm114_vm3 = vcmp.eq.s32.totalorder %v1755_v54, %v70_v57 }
  0x87   :  { %v1349_v61 = vsel %vm209_vm2, 1.0, %v1599_v60 }
  0x88   :  { %v150_v58 = vpop.permute.xlu1 %149 }
  0x89   :  { %vm194_vm4 = vcmp.eq.s32.totalorder %v1755_v54, %v150_v58  ;;  %v73_v59 = vpop.permute.xlu0 %72 }
  0x8a   :  { %vm210_vm5 = vmor %vm114_vm3, %vm194_vm4  ;;  %vm115_vm7 = vcmp.eq.s32.totalorder %v1755_v54, %v73_v59 }
  0x8b   :  { %v1350_v62 = vsel %vm210_vm5, 1.0, %v1599_v60 }
  0x8c   :  { %v76_v63 = vpop.permute.xlu1 %75  ;;  %v257_v0 = vpack.c.bf16 %v1350_v62, %v1349_v61 }
  0x8d   :  { %v153_v1 = vpop.permute.xlu0 %152  ;;  %vm116_vm9 = vcmp.eq.s32.totalorder %v1755_v54, %v76_v63 }
  0x8e   :  { %1440 = vmatprep.mubr.msk.bf16.mxu0 %vm289_vm6, %v257_v0  ;;  %vm195_vm8 = vcmp.eq.s32.totalorder %v1755_v54, %v153_v1 }
  0x8f   :  { %vm211_vm10 = vmor %vm115_vm7, %vm195_vm8 }
  0x90   :  { %v156_v2 = vpop.permute.xlu1 %155  ;;  %v1351_v3 = vsel %vm211_vm10, 1.0, %v1599_v60 }
  0x91   :  { %vm196_vm11 = vcmp.eq.s32.totalorder %v1755_v54, %v156_v2  ;;  %v79_v5 = vpop.permute.xlu0 %78 }
  0x92   :  { %vm212_vm12 = vmor %vm116_vm9, %vm196_vm11  ;;  %vm117_vm13 = vcmp.eq.s32.totalorder %v1755_v54, %v79_v5 }
  0x93   :  { %v1352_v4 = vsel %vm212_vm12, 1.0, %v1599_v60 }
  0x94   :  { %v258_v6 = vpack.c.bf16 %v1352_v4, %v1351_v3  ;;  %v82_v7 = vpop.permute.xlu1 %81 }
  0x95   :  { %v159_v8 = vpop.permute.xlu0 %158  ;;  %vm118_vm15 = vcmp.eq.s32.totalorder %v1755_v54, %v82_v7 }
  0x96   :  { %1441 = vmatmul.mubr.msk.bf16.vlgmr.msra.gmra.mrb[0].mxu0 %vm289_vm6, %v258_v6  ;;  %vm197_vm14 = vcmp.eq.s32.totalorder %v1755_v54, %v159_v8 }
  0x97   :  { %vm213_vm0 = vmor %vm117_vm13, %vm197_vm14  ;;  %1477 = vmatpush3.bf16.msra.mxu0 %v1534_v49 }
  0x98   :  { %v162_v9 = vpop.permute.xlu1 %161  ;;  %v1353_v10 = vsel %vm213_vm0, 1.0, %v1599_v60  ;;  %1478 = vmatprep.subr.bf16.mxu0 %v1535_v50 }
  0x99   :  { %vm198_vm1 = vcmp.eq.s32.totalorder %v1755_v54, %v162_v9  ;;  %v85_v12 = vpop.permute.xlu0 %84 }
  0x9a   :  { %vm214_vm2 = vmor %vm118_vm15, %vm198_vm1  ;;  %vm119_vm3 = vcmp.eq.s32.totalorder %v1755_v54, %v85_v12 }
  0x9b   :  { %v1354_v11 = vsel %vm214_vm2, 1.0, %v1599_v60  ;;  %1479 = vmatpush3.bf16.msra.mxu0 %v1535_v50 }
  0x9c   :  { %v259_v13 = vpack.c.bf16 %v1354_v11, %v1353_v10  ;;  %v88_v14 = vpop.permute.xlu1 %87  ;;  %1480 = vmatprep.subr.bf16.mxu0 %v1536_v51 }
  0x9d   :  { %v165_v15 = vpop.permute.xlu0 %164  ;;  %vm120_vm5 = vcmp.eq.s32.totalorder %v1755_v54, %v88_v14  ;;  %v1537_v14 = vld [vmem:[%s2292_s5 + $0x18] sm:$0xff]  }
  0x9e   :  { %1444 = vmatprep.mubr.msk.bf16.mxu0 %vm289_vm6, %v259_v13  ;;  %vm199_vm4 = vcmp.eq.s32.totalorder %v1755_v54, %v165_v15  ;;  %v1538_v15 = vld [vmem:[%s2292_s5 + $0x20] sm:$0xff]  }
  0x9f   :  { %vm215_vm7 = vmor %vm119_vm3, %vm199_vm4  ;;  %1481 = vmatpush3.bf16.msra.mxu0 %v1536_v51 }
  0xa0   :  { %v168_v16 = vpop.permute.xlu1 %167  ;;  %v1355_v17 = vsel %vm215_vm7, 1.0, %v1599_v60  ;;  %1482 = vmatprep.subr.bf16.mxu0 %v1537_v14 }
  0xa1   :  { %vm200_vm8 = vcmp.eq.s32.totalorder %v1755_v54, %v168_v16  ;;  %v91_v19 = vpop.permute.xlu0 %90  ;;  %v1539_v16 = vld [vmem:[%s2292_s5 + $0x28] sm:$0xff]  }
  0xa2   :  { %vm216_vm9 = vmor %vm120_vm5, %vm200_vm8  ;;  %vm121_vm10 = vcmp.eq.s32.totalorder %v1755_v54, %v91_v19  ;;  %v1851_v19 = vld [vmem:[%s2294_s7] ss:$0 sm:$0xff] }
  0xa3   :  { %v1356_v18 = vsel %vm216_vm9, 1.0, %v1599_v60  ;;  %1483 = vmatpush3.bf16.msra.mxu0 %v1537_v14  ;;  %1099 = vbcast.lane.b32.xlu1 %v1851_v19, 256 }
  0xa4   :  { %v260_v20 = vpack.c.bf16 %v1356_v18, %v1355_v17  ;;  %v94_v21 = vpop.permute.xlu1 %93  ;;  %1484 = vmatprep.subr.bf16.mxu0 %v1538_v15  ;;  %v1540_v17 = vld [vmem:[%s2292_s5 + $0x30] sm:$0xff]   ;;  %v1541_v18 = vld [vmem:[%s2292_s5 + $0x38] sm:$0xff]   ;;  %1103 = vbcast.lane.b32.xlu0 %v1851_v19, 264 }
  0xa5   :  { %v171_v22 = vpop.permute.xlu0 %170  ;;  %vm122_vm12 = vcmp.eq.s32.totalorder %v1755_v54, %v94_v21 }
  0xa6   :  { %1445 = vmatmul.mubr.msk.bf16.gmra.mrb[4].mxu0 %vm289_vm6, %v260_v20  ;;  %vm201_vm11 = vcmp.eq.s32.totalorder %v1755_v54, %v171_v22  ;;  %v1866_v20 = vld [vmem:[%s2291_s4] ss:$0 sm:$0xff] }
  0xa7   :  { %vm217_vm13 = vmor %vm121_vm10, %vm201_vm11  ;;  %1485 = vmatpush3.bf16.msra.mxu0 %v1538_v15  ;;  %1107 = vbcast.lane.b32.xlu1 %v1851_v19, 272 }
  0xa8   :  { %v174_v23 = vpop.permute.xlu1 %173  ;;  %v1357_v24 = vsel %vm217_vm13, 1.0, %v1599_v60  ;;  %1486 = vmatprep.subr.bf16.mxu0 %v1539_v16  ;;  %1115 = vbcast.lane.b32.xlu0 %v1851_v19, 288 }
  0xa9   :  { %vm202_vm14 = vcmp.eq.s32.totalorder %v1755_v54, %v174_v23  ;;  %v97_v26 = vpop.permute.xlu0 %96 }
  0xaa   :  { %vm218_vm15 = vmor %vm122_vm12, %vm202_vm14  ;;  %vm123_vm0 = vcmp.eq.s32.totalorder %v1755_v54, %v97_v26 }
  0xab   :  { %v1358_v25 = vsel %vm218_vm15, 1.0, %v1599_v60  ;;  %1487 = vmatpush3.bf16.msra.mxu0 %v1539_v16  ;;  %1111 = vbcast.lane.b32.xlu1 %v1851_v19, 280 }
  0xac   :  { %v261_v27 = vpack.c.bf16 %v1358_v25, %v1357_v24  ;;  %v100_v28 = vpop.permute.xlu1 %99  ;;  %1488 = vmatprep.subr.bf16.mxu0 %v1540_v17  ;;  %1123 = vbcast.lane.b32.xlu0 %v1851_v19, 304 }
  0xad   :  { %v177_v29 = vpop.permute.xlu0 %176  ;;  %vm124_vm2 = vcmp.eq.s32.totalorder %v1755_v54, %v100_v28 }
  0xae   :  { %1448 = vmatprep.mubr.msk.bf16.mxu0 %vm289_vm6, %v261_v27  ;;  %vm203_vm1 = vcmp.eq.s32.totalorder %v1755_v54, %v177_v29 }
  0xaf   :  { %vm219_vm3 = vmor %vm123_vm0, %vm203_vm1  ;;  %1489 = vmatpush3.bf16.msra.mxu0 %v1540_v17  ;;  %1119 = vbcast.lane.b32.xlu1 %v1851_v19, 296 }
  0xb0   :  { %v180_v30 = vpop.permute.xlu1 %179  ;;  %v1359_v31 = vsel %vm219_vm3, 1.0, %v1599_v60  ;;  %1490 = vmatprep.subr.bf16.mxu0 %v1541_v18  ;;  %1131 = vbcast.lane.b32.xlu0 %v1851_v19, 320  ;;  %vm756_vm3 = vcmp.lt.s32.totalorder %v1755_v54, 8 }
  0xb1   :  { %vm204_vm4 = vcmp.eq.s32.totalorder %v1755_v54, %v180_v30  ;;  %v103_v33 = vpop.permute.xlu0 %102 }
  0xb2   :  { %vm220_vm5 = vmor %vm124_vm2, %vm204_vm4  ;;  %vm125_vm7 = vcmp.eq.s32.totalorder %v1755_v54, %v103_v33 }
  0xb3   :  { %v1360_v32 = vsel %vm220_vm5, 1.0, %v1599_v60  ;;  %1491 = vmatpush3.bf16.msra.mxu0 %v1541_v18  ;;  %1127 = vbcast.lane.b32.xlu1 %v1851_v19, 312 }
  0xb4   :  { %v262_v34 = vpack.c.bf16 %v1360_v32, %v1359_v31  ;;  %v106_v35 = vpop.permute.xlu1 %105 }
  0xb5   :  { %v183_v36 = vpop.permute.xlu0 %182  ;;  %vm126_vm9 = vcmp.eq.s32.totalorder %v1755_v54, %v106_v35 }
  0xb6   :  { %1449 = vmatmul.mubr.msk.bf16.gmra.mrb[8].mxu0 %vm289_vm6, %v262_v34  ;;  %vm205_vm8 = vcmp.eq.s32.totalorder %v1755_v54, %v183_v36 }
  0xb7   :  { %vm221_vm10 = vmor %vm125_vm7, %vm205_vm8  ;;  %1135 = vbcast.lane.b32.xlu1 %v1851_v19, 328 }
  0xb8   :  { %v186_v37 = vpop.permute.xlu1 %185  ;;  %v1361_v38 = vsel %vm221_vm10, 1.0, %v1599_v60 }
  0xb9   :  { %vm206_vm11 = vcmp.eq.s32.totalorder %v1755_v54, %v186_v37  ;;  %v109_v40 = vpop.permute.xlu0 %108 }
  0xba   :  { %vm222_vm12 = vmor %vm126_vm9, %vm206_vm11  ;;  %vm127_vm13 = vcmp.eq.s32.totalorder %v1755_v54, %v109_v40 }
  0xbb   :  { %v1362_v39 = vsel %vm222_vm12, 1.0, %v1599_v60 }
  0xbc   :  { %v263_v41 = vpack.c.bf16 %v1362_v39, %v1361_v38  ;;  %v112_v42 = vpop.permute.xlu1 %111 }
  0xbd   :  { %v189_v43 = vpop.permute.xlu0 %188  ;;  %vm128_vm15 = vcmp.eq.s32.totalorder %v1755_v54, %v112_v42 }
  0xbe   :  { %1452 = vmatprep.mubr.msk.bf16.mxu0 %vm289_vm6, %v263_v41  ;;  %vm207_vm14 = vcmp.eq.s32.totalorder %v1755_v54, %v189_v43 }
  0xbf   :  { %vm223_vm0 = vmor %vm127_vm13, %vm207_vm14 }
  0xc0   :  { %v192_v44 = vpop.permute.xlu1 %191  ;;  %v1363_v45 = vsel %vm223_vm0, 1.0, %v1599_v60 }
  0xc1   :  { %vm208_vm1 = vcmp.eq.s32.totalorder %v1755_v54, %v192_v44 }
  0xc2   :  { %vm224_vm2 = vmor %vm128_vm15, %vm208_vm1 }
  0xc3   :  { %v1364_v46 = vsel %vm224_vm2, 1.0, %v1599_v60 }
  0xc4   :  { %v264_v47 = vpack.c.bf16 %v1364_v46, %v1363_v45 }
  0xc6   :  { %1453 = vmatmul.mubr.msk.bf16.gmra.mrb[12].mxu0 %vm289_vm6, %v264_v47  ;;  %vm442_vm6 = vcmask 261120  }
 0x169   :  { %v1442_v52 = vpop.f32.mrb[0].mxu0 }
 0x16a   :  { %v348_v55 = vpop.f32.mrb[1].mxu0 }
 0x16b   :  { %v1443_v56 = vpop.f32.mrb[2].mxu0 }
 0x16c   :  { %v412_v57 = vpack.c.bf16 %v1443_v56, %v1442_v52  ;;  %v351_v58 = vpop.f32.mrb[3].mxu0 }
 0x16d   :  { %v411_v59 = vpack.c.bf16 %v351_v58, %v348_v55 }
 0x16f   :  { %1460 = vmatprep.mubr.msk.bf16.mxu1 %vm442_vm6, %v411_v59 }
 0x170   :  { %1461 = vmatmul.mubr.msk.bf16.vlgmr.msra.gmra.mrb[0].mxu1 %vm442_vm6, %v412_v57 }
 0x171   :  { %1516 = vmatpush3.bf16.msra.mxu1 %v1534_v49 }
 0x172   :  { %1509 = vmatprep.subr.bf16.mxu1 %v1535_v50 }
 0x175   :  { %1517 = vmatpush3.bf16.msra.mxu1 %v1535_v50 }
 0x176   :  { %1510 = vmatprep.subr.bf16.mxu1 %v1536_v51 }
 0x179   :  { %v1446_v60 = vpop.f32.mrb[4].mxu0  ;;  %1518 = vmatpush3.bf16.msra.mxu1 %v1536_v51 }
 0x17a   :  { %v364_v61 = vpop.f32.mrb[5].mxu0  ;;  %1511 = vmatprep.subr.bf16.mxu1 %v1537_v14 }
 0x17b   :  { %v1447_v62 = vpop.f32.mrb[6].mxu0 }
 0x17c   :  { %v414_v63 = vpack.c.bf16 %v1447_v62, %v1446_v60  ;;  %v367_v0 = vpop.f32.mrb[7].mxu0 }
 0x17d   :  { %v413_v1 = vpack.c.bf16 %v367_v0, %v364_v61  ;;  %1519 = vmatpush3.bf16.msra.mxu1 %v1537_v14 }
 0x17e   :  { %1512 = vmatprep.subr.bf16.mxu1 %v1538_v15 }
 0x17f   :  { %1464 = vmatprep.mubr.msk.bf16.mxu1 %vm442_vm6, %v413_v1 }
 0x180   :  { %1465 = vmatmul.mubr.msk.bf16.gmra.mrb[4].mxu1 %vm442_vm6, %v414_v63 }
 0x181   :  { %1520 = vmatpush3.bf16.msra.mxu1 %v1538_v15  ;;  %v1387_v15 = vld [vmem:[%s2293_s6] ss:$0 sm:$0xff]  ;;  %s1600_s6 = smov [#allocation2]  }
 0x182   :  { %1513 = vmatprep.subr.bf16.mxu1 %v1539_v16  ;;  %s1341_s26 = sshll.u32 %s1600_s6, 4  ;;  %s1342_s26 = int_to_ptr.vmem [resolvable:$true] %s1341_s26 }
 0x183   :  { %s1574_s27 = scalar_lea.vmem %s1342_s26, 16  ;;  %s1578_s28 = scalar_lea.vmem %s1342_s26, 32 }
 0x184   :  { %p1575_p0 = scmp.ne.s32.totalorder %s1342_s26, %s1574_s27  ;;  %p1579_p1 = scmp.lt.s32.totalorder %s1342_s26, %s1342_s26 }
 0x185   :  { %1521 = vmatpush3.bf16.msra.mxu1 %v1539_v16  ;;  %p1580_p2 = scmp.lt.s32.totalorder %s1578_s28, %s1574_s27 }
 0x186   :  { %1514 = vmatprep.subr.bf16.mxu1 %v1540_v17 }
 0x187   :  { %p1581_p3 = por %p1580_p2, %p1579_p1 }
 0x189   :  { %v1450_v2 = vpop.f32.mrb[8].mxu0  ;;  %1522 = vmatpush3.bf16.msra.mxu1 %v1540_v17  ;;  %p1582_p4 = pnand %p1581_p3, %p1575_p0 }
 0x18a   :  { %v380_v3 = vpop.f32.mrb[9].mxu0  ;;  %1515 = vmatprep.subr.bf16.mxu1 %v1541_v18 }
 0x18b   :  { %v1451_v4 = vpop.f32.mrb[10].mxu0 }
 0x18c   :  { %v416_v5 = vpack.c.bf16 %v1451_v4, %v1450_v2  ;;  %v383_v6 = vpop.f32.mrb[11].mxu0 }
 0x18d   :  { %v415_v7 = vpack.c.bf16 %v383_v6, %v380_v3  ;;  %1523 = vmatpush3.bf16.msra.mxu1 %v1541_v18 }
 0x18f   :  { %1468 = vmatprep.mubr.msk.bf16.mxu1 %vm442_vm6, %v415_v7 }
 0x190   :  { %1469 = vmatmul.mubr.msk.bf16.gmra.mrb[8].mxu1 %vm442_vm6, %v416_v5 }
 0x199   :  { %v1454_v8 = vpop.f32.mrb[12].mxu0 }
 0x19a   :  { %v396_v9 = vpop.f32.mrb[13].mxu0 }
 0x19b   :  { %v1455_v10 = vpop.f32.mrb[14].mxu0 }
 0x19c   :  { %v418_v11 = vpack.c.bf16 %v1455_v10, %v1454_v8  ;;  %v399_v12 = vpop.f32.mrb[15].mxu0 }
 0x19d   :  { %v417_v13 = vpack.c.bf16 %v399_v12, %v396_v9 }
 0x19f   :  { %1472 = vmatprep.mubr.msk.bf16.mxu1 %vm442_vm6, %v417_v13 }
 0x1a0   :  { %1473 = vmatmul.mubr.msk.bf16.gmra.mrb[12].mxu1 %vm442_vm6, %v418_v11 }
 0x243   :  { %v1462_v21 = vpop.f32.mrb[0].mxu1 }
 0x244   :  { %v510_v22 = vadd.f32 %v1462_v21, %v1866_v20  ;;  %v501_v23 = vpop.f32.mrb[1].mxu1 }
 0x245   :  { %v502_v24 = vadd.f32 %v1866_v20, %v501_v23  ;;  %v1463_v25 = vpop.f32.mrb[2].mxu1 }
 0x246   :  { %1542 = vtanh.f32 %v510_v22  ;;  %v513_v26 = vadd.f32 %v1463_v25, %v1866_v20  ;;  %v504_v27 = vpop.f32.mrb[3].mxu1 }
 0x247   :  { %1544 = vtanh.f32 %v502_v24  ;;  %v505_v28 = vadd.f32 %v1866_v20, %v504_v27 }
 0x248   :  { %1546 = vtanh.f32 %v513_v26 }
 0x249   :  { %1548 = vtanh.f32 %v505_v28 }
 0x250   :  { %v1543_v29 = vpop.eup %1542 }
 0x251   :  { %v1545_v30 = vpop.eup %1544 }
 0x252   :  { %v1547_v31 = vpop.eup %1546 }
 0x253   :  { %v1549_v32 = vpop.eup %1548  ;;  %v1466_v33 = vpop.f32.mrb[4].mxu1  ;;  %v581_v34 = vpack.c.bf16 %v1547_v31, %v1543_v29 }
 0x254   :  { %v526_v35 = vadd.f32 %v1466_v33, %v1866_v20  ;;  %v517_v36 = vpop.f32.mrb[5].mxu1  ;;  %v580_v37 = vpack.c.bf16 %v1549_v32, %v1545_v30 }
 0x255   :  { %v518_v38 = vadd.f32 %v1866_v20, %v517_v36  ;;  %v1467_v39 = vpop.f32.mrb[6].mxu1 }
 0x256   :  { %1550 = vtanh.f32 %v526_v35  ;;  %v529_v40 = vadd.f32 %v1467_v39, %v1866_v20  ;;  %v520_v41 = vpop.f32.mrb[7].mxu1  ;;  %1492 = vmatprep.mubr.bf16.mxu0 %v580_v37 }
 0x257   :  { %1552 = vtanh.f32 %v518_v38  ;;  %v521_v42 = vadd.f32 %v1866_v20, %v520_v41  ;;  %1493 = vmatmul.mubr.bf16.vlgmr.msra.gmra.mrb[16].mxu0 %v581_v34 }
 0x258   :  { %1554 = vtanh.f32 %v529_v40 }
 0x259   :  { %1556 = vtanh.f32 %v521_v42 }
 0x260   :  { %v1551_v43 = vpop.eup %1550 }
 0x261   :  { %v1553_v44 = vpop.eup %1552 }
 0x262   :  { %v1555_v45 = vpop.eup %1554 }
 0x263   :  { %v1557_v46 = vpop.eup %1556  ;;  %v1470_v47 = vpop.f32.mrb[8].mxu1  ;;  %v583_v48 = vpack.c.bf16 %v1555_v45, %v1551_v43 }
 0x264   :  { %v542_v49 = vadd.f32 %v1470_v47, %v1866_v20  ;;  %v533_v50 = vpop.f32.mrb[9].mxu1  ;;  %v582_v51 = vpack.c.bf16 %v1557_v46, %v1553_v44 }
 0x265   :  { %v534_v52 = vadd.f32 %v1866_v20, %v533_v50  ;;  %v1471_v55 = vpop.f32.mrb[10].mxu1 }
 0x266   :  { %1558 = vtanh.f32 %v542_v49  ;;  %v545_v56 = vadd.f32 %v1471_v55, %v1866_v20  ;;  %v536_v57 = vpop.f32.mrb[11].mxu1  ;;  %1496 = vmatprep.mubr.bf16.mxu1 %v582_v51 }
 0x267   :  { %1560 = vtanh.f32 %v534_v52  ;;  %v537_v58 = vadd.f32 %v1866_v20, %v536_v57  ;;  %1497 = vmatmul.mubr.bf16.vlgmr.msra.gmra.mrb[16].mxu1 %v583_v48 }
 0x268   :  { %1562 = vtanh.f32 %v545_v56 }
 0x269   :  { %1564 = vtanh.f32 %v537_v58 }
 0x270   :  { %v1559_v59 = vpop.eup %1558 }
 0x271   :  { %v1561_v60 = vpop.eup %1560 }
 0x272   :  { %v1563_v61 = vpop.eup %1562 }
 0x273   :  { %v1565_v62 = vpop.eup %1564  ;;  %v1474_v63 = vpop.f32.mrb[12].mxu1  ;;  %v585_v0 = vpack.c.bf16 %v1563_v61, %v1559_v59 }
 0x274   :  { %v558_v1 = vadd.f32 %v1474_v63, %v1866_v20  ;;  %v549_v2 = vpop.f32.mrb[13].mxu1  ;;  %v584_v3 = vpack.c.bf16 %v1565_v62, %v1561_v60 }
 0x275   :  { %v550_v4 = vadd.f32 %v1866_v20, %v549_v2  ;;  %v1475_v5 = vpop.f32.mrb[14].mxu1 }
 0x276   :  { %1566 = vtanh.f32 %v558_v1  ;;  %v561_v6 = vadd.f32 %v1475_v5, %v1866_v20  ;;  %v552_v7 = vpop.f32.mrb[15].mxu1  ;;  %1500 = vmatprep.mubr.bf16.mxu1 %v584_v3  ;;  %v1970_v3 = vpop.permute.xlu1 %1099 }
 0x277   :  { %1568 = vtanh.f32 %v550_v4  ;;  %v553_v8 = vadd.f32 %v1866_v20, %v552_v7  ;;  %1501 = vmatmul.mubr.bf16.gmra.mrb[20].mxu1 %v585_v0  ;;  %v1974_v5 = vpop.permute.xlu0 %1103 }
 0x278   :  { %1570 = vtanh.f32 %v561_v6 }
 0x279   :  { %1572 = vtanh.f32 %v553_v8 }
 0x27a   :  { %v1972_v4 = vpop.permute.xlu1 %1107 }
 0x27b   :  { %v1978_v7 = vpop.permute.xlu0 %1115 }
 0x27e   :  { %v1976_v6 = vpop.permute.xlu1 %1111 }
 0x280   :  { %v1567_v9 = vpop.eup %1566 }
 0x281   :  { %v1569_v10 = vpop.eup %1568 }
 0x282   :  { %v1571_v11 = vpop.eup %1570  ;;  %v1980_v8 = vpop.permute.xlu1 %1119 }
 0x283   :  { %v1573_v12 = vpop.eup %1572  ;;  %v587_v13 = vpack.c.bf16 %v1571_v11, %v1567_v9  ;;  %v1982_v9 = vpop.permute.xlu0 %1123 }
 0x284   :  { %v586_v14 = vpack.c.bf16 %v1573_v12, %v1569_v10 }
 0x286   :  { %1504 = vmatprep.mubr.bf16.mxu1 %v586_v14  ;;  %v1984_v10 = vpop.permute.xlu1 %1127 }
 0x287   :  { %1505 = vmatmul.mubr.bf16.gmra.mrb[24].mxu1 %v587_v13  ;;  %v1986_v11 = vpop.permute.xlu0 %1131 }
 0x28a   :  { %v1988_v12 = vpop.permute.xlu1 %1135 }
 0x32a   :  { %v1494_v16 = vpop.f32.mrb[16].mxu0 }
 0x32b   :  { %v702_v17 = vadd.f32 %v1494_v16, %v1387_v15  ;;  %v693_v18 = vpop.f32.mrb[17].mxu0 }
 0x32c   :  { %v1495_v20 = vpop.f32.mrb[18].mxu0  ;;  %v694_v21 = vadd.f32 %v1387_v15, %v693_v18 }
 0x32d   :  { %v696_v22 = vpop.f32.mrb[19].mxu0  ;;  %v1890_v23 = vsel %vm756_vm3, %v702_v17, -inf  ;;  %v705_v26 = vadd.f32 %v1495_v20, %v1387_v15 }
 0x32e   :  { %v697_v24 = vadd.f32 %v1387_v15, %v696_v22  ;;  %777 = vmax.xlane.f32.xlu0 %v1890_v23  ;;  %v1900_v27 = vsel %vm756_vm3, %v694_v21, -inf }
 0x32f   :  { %v1905_v28 = vsel %vm756_vm3, %v705_v26, -inf }
 0x330   :  { %v1895_v25 = vsel %vm756_vm3, %v697_v24, -inf }
 0x331   :  { %775 = vmax.xlane.f32.xlu1 %v1895_v25 }
 0x332   :  { %773 = vmax.xlane.f32.xlu0 %v1900_v27 }
 0x336   :  { %779 = vmax.xlane.f32.xlu0 %v1905_v28 }
 0x33a   :  { %v1498_v29 = vpop.f32.mrb[16].mxu1 }
 0x33b   :  { %v718_v30 = vadd.f32 %v1498_v29, %v1387_v15  ;;  %v709_v31 = vpop.f32.mrb[17].mxu1 }
 0x33c   :  { %v1499_v32 = vpop.f32.mrb[18].mxu1  ;;  %v710_v33 = vadd.f32 %v1387_v15, %v709_v31 }
 0x33d   :  { %v721_v34 = vadd.f32 %v1499_v32, %v1387_v15  ;;  %v712_v35 = vpop.f32.mrb[19].mxu1  ;;  %v1910_v36 = vsel %vm756_vm3, %v718_v30, -inf }
 0x33e   :  { %785 = vmax.xlane.f32.xlu1 %v1910_v36  ;;  %v713_v37 = vadd.f32 %v1387_v15, %v712_v35  ;;  %v1920_v39 = vsel %vm756_vm3, %v710_v33, -inf }
 0x33f   :  { %v1915_v38 = vsel %vm756_vm3, %v721_v34, -inf }
 0x340   :  { %787 = vmax.xlane.f32.xlu0 %v1915_v38  ;;  %v1925_v40 = vsel %vm756_vm3, %v713_v37, -inf }
 0x342   :  { %781 = vmax.xlane.f32.xlu1 %v1920_v39 }
 0x344   :  { %783 = vmax.xlane.f32.xlu0 %v1925_v40 }
 0x34a   :  { %v1502_v41 = vpop.f32.mrb[20].mxu1 }
 0x34b   :  { %v734_v42 = vadd.f32 %v1502_v41, %v1387_v15  ;;  %v725_v43 = vpop.f32.mrb[21].mxu1 }
 0x34c   :  { %v1503_v44 = vpop.f32.mrb[22].mxu1  ;;  %v726_v45 = vadd.f32 %v1387_v15, %v725_v43 }
 0x34d   :  { %v737_v46 = vadd.f32 %v1503_v44, %v1387_v15  ;;  %v728_v47 = vpop.f32.mrb[23].mxu1  ;;  %v1930_v48 = vsel %vm756_vm3, %v734_v42, -inf }
 0x34e   :  { %793 = vmax.xlane.f32.xlu1 %v1930_v48  ;;  %v729_v49 = vadd.f32 %v1387_v15, %v728_v47  ;;  %v1940_v51 = vsel %vm756_vm3, %v726_v45, -inf }
 0x34f   :  { %v1935_v50 = vsel %vm756_vm3, %v737_v46, -inf }
 0x350   :  { %795 = vmax.xlane.f32.xlu0 %v1935_v50  ;;  %v1945_v52 = vsel %vm756_vm3, %v729_v49, -inf }
 0x352   :  { %789 = vmax.xlane.f32.xlu1 %v1940_v51 }
 0x354   :  { %791 = vmax.xlane.f32.xlu0 %v1945_v52 }
 0x35a   :  { %v1506_v55 = vpop.f32.mrb[24].mxu1 }
 0x35b   :  { %v750_v56 = vadd.f32 %v1506_v55, %v1387_v15  ;;  %v741_v57 = vpop.f32.mrb[25].mxu1 }
 0x35c   :  { %v1507_v58 = vpop.f32.mrb[26].mxu1  ;;  %v742_v59 = vadd.f32 %v1387_v15, %v741_v57 }
 0x35d   :  { %v753_v60 = vadd.f32 %v1507_v58, %v1387_v15  ;;  %v744_v61 = vpop.f32.mrb[27].mxu1  ;;  %v1950_v62 = vsel %vm756_vm3, %v750_v56, -inf }
 0x35e   :  { %801 = vmax.xlane.f32.xlu1 %v1950_v62  ;;  %v745_v63 = vadd.f32 %v1387_v15, %v744_v61  ;;  %v1960_v1 = vsel %vm756_vm3, %v742_v59, -inf }
 0x35f   :  { %v1955_v0 = vsel %vm756_vm3, %v753_v60, -inf }
 0x360   :  { %803 = vmax.xlane.f32.xlu0 %v1955_v0  ;;  %v1965_v2 = vsel %vm756_vm3, %v745_v63, -inf }
 0x362   :  { %797 = vmax.xlane.f32.xlu1 %v1960_v1 }
 0x364   :  { %799 = vmax.xlane.f32.xlu0 %v1965_v2 }
 0x373   :  { %1143 = vbcast.lane.b32.xlu1 %v1851_v19, 344 }
 0x37a   :  { %1139 = vbcast.lane.b32.xlu0 %v1851_v19, 336 }
 0x3bb   :  { %v778_v13 = vpop.xlane.xlu0 %777 }
 0x3bc   :  { %vm807_vm4 = vcmp.eq.f32.partialorder %v1890_v23, %v778_v13 }
 0x3bd   :  { %v1992_v14 = vsel %vm807_vm4, %v1755_v54, 128 }
 0x3be   :  { %v866_v15 = vshra.s32 %v1992_v14, 16  ;;  %v776_v16 = vpop.xlane.xlu1 %775 }
 0x3bf   :  { %v774_v17 = vpop.xlane.xlu0 %773  ;;  %vm806_vm7 = vcmp.eq.f32.partialorder %v1895_v25, %v776_v16 }
 0x3c0   :  { %vm805_vm5 = vcmp.eq.f32.partialorder %v1900_v27, %v774_v17  ;;  %v1996_v18 = vcvt.s32.f32 %v866_v15  ;;  %v2008_v24 = vsel %vm806_vm7, %v1755_v54, 128 }
 0x3c1   :  { %v1999_v20 = vsel %vm805_vm5, %v1755_v54, 128  ;;  %v852_v29 = vshra.s32 %v2008_v24, 16 }
 0x3c2   :  { %869 = vmin.xlane.f32.xlu1 %v1996_v18  ;;  %v838_v21 = vshra.s32 %v1999_v20, 16 }
 0x3c3   :  { %v780_v22 = vpop.xlane.xlu0 %779 }
 0x3c4   :  { %vm808_vm8 = vcmp.eq.f32.partialorder %v1905_v28, %v780_v22  ;;  %v2005_v23 = vcvt.s32.f32 %v838_v21  ;;  %v2020_v28 = vcvt.s32.f32 %v852_v29 }
 0x3c5   :  { %v2011_v26 = vsel %vm808_vm8, %v1755_v54, 128 }
 0x3c6   :  { %841 = vmin.xlane.f32.xlu1 %v2005_v23  ;;  %v880_v27 = vshra.s32 %v2011_v26, 16 }
 0x3c8   :  { %v2015_v25 = vcvt.s32.f32 %v880_v27 }
 0x3ca   :  { %883 = vmin.xlane.f32.xlu0 %v2015_v25 }
 0x3cb   :  { %v786_v30 = vpop.xlane.xlu1 %785 }
 0x3cc   :  { %vm811_vm9 = vcmp.eq.f32.partialorder %v1910_v36, %v786_v30 }
 0x3cd   :  { %v2023_v31 = vsel %vm811_vm9, %v1755_v54, 128  ;;  %v788_v32 = vpop.xlane.xlu0 %787 }
 0x3ce   :  { %vm812_vm10 = vcmp.eq.f32.partialorder %v1915_v38, %v788_v32  ;;  %855 = vmin.xlane.f32.xlu0 %v2020_v28  ;;  %v922_v33 = vshra.s32 %v2023_v31, 16 }
 0x3cf   :  { %v2029_v34 = vsel %vm812_vm10, %v1755_v54, 128  ;;  %v782_v35 = vpop.xlane.xlu1 %781 }
 0x3d0   :  { %vm809_vm11 = vcmp.eq.f32.partialorder %v1920_v39, %v782_v35  ;;  %v2032_v37 = vcvt.s32.f32 %v922_v33  ;;  %v936_v36 = vshra.s32 %v2029_v34, 16 }
 0x3d1   :  { %v2036_v41 = vsel %vm809_vm11, %v1755_v54, 128  ;;  %v784_v42 = vpop.xlane.xlu0 %783 }
 0x3d2   :  { %vm810_vm12 = vcmp.eq.f32.partialorder %v1925_v40, %v784_v42  ;;  %925 = vmin.xlane.f32.xlu1 %v2032_v37  ;;  %v2040_v38 = vcvt.s32.f32 %v936_v36  ;;  %v894_v43 = vshra.s32 %v2036_v41, 16 }
 0x3d3   :  { %v2044_v44 = vsel %vm810_vm12, %v1755_v54, 128 }
 0x3d4   :  { %939 = vmin.xlane.f32.xlu0 %v2040_v38  ;;  %v2047_v39 = vcvt.s32.f32 %v894_v43  ;;  %v908_v45 = vshra.s32 %v2044_v44, 16 }
 0x3d6   :  { %897 = vmin.xlane.f32.xlu1 %v2047_v39  ;;  %v2051_v46 = vcvt.s32.f32 %v908_v45  ;;  %v837_v45 = vand.u32 65535, %v1999_v20  ;;  %v851_v20 = vand.u32 65535, %v2008_v24  ;;  %v893_v24 = vand.u32 65535, %v2036_v41 }
 0x3d8   :  { %911 = vmin.xlane.f32.xlu0 %v2051_v46  ;;  %v895_v41 = vcvt.s32.f32 %v893_v24 }
 0x3db   :  { %v794_v40 = vpop.xlane.xlu1 %793 }
 0x3dc   :  { %vm815_vm13 = vcmp.eq.f32.partialorder %v1930_v48, %v794_v40 }
 0x3dd   :  { %v2056_v47 = vsel %vm815_vm13, %v1755_v54, 128  ;;  %v796_v49 = vpop.xlane.xlu0 %795 }
 0x3de   :  { %vm816_vm14 = vcmp.eq.f32.partialorder %v1935_v50, %v796_v49  ;;  %v978_v55 = vshra.s32 %v2056_v47, 16 }
 0x3df   :  { %v2061_v56 = vsel %vm816_vm14, %v1755_v54, 128  ;;  %v790_v57 = vpop.xlane.xlu1 %789 }
 0x3e0   :  { %vm813_vm15 = vcmp.eq.f32.partialorder %v1940_v51, %v790_v57  ;;  %v2064_v58 = vcvt.s32.f32 %v978_v55  ;;  %v992_v59 = vshra.s32 %v2061_v56, 16  ;;  %v879_v57 = vand.u32 65535, %v2011_v26 }
 0x3e1   :  { %v2068_v48 = vsel %vm813_vm15, %v1755_v54, 128  ;;  %v792_v60 = vpop.xlane.xlu0 %791  ;;  %v921_v26 = vand.u32 65535, %v2023_v31 }
 0x3e2   :  { %vm814_vm0 = vcmp.eq.f32.partialorder %v1945_v52, %v792_v60  ;;  %981 = vmin.xlane.f32.xlu1 %v2064_v58  ;;  %v2072_v50 = vcvt.s32.f32 %v992_v59  ;;  %v950_v61 = vshra.s32 %v2068_v48, 16 }
 0x3e3   :  { %v2076_v63 = vsel %vm814_vm0, %v1755_v54, 128 }
 0x3e4   :  { %995 = vmin.xlane.f32.xlu0 %v2072_v50  ;;  %v2079_v51 = vcvt.s32.f32 %v950_v61  ;;  %v964_v13 = vshra.s32 %v2076_v63, 16  ;;  %v839_v61 = vcvt.s32.f32 %v837_v45 }
 0x3e6   :  { %953 = vmin.xlane.f32.xlu1 %v2079_v51  ;;  %v2083_v15 = vcvt.s32.f32 %v964_v13 }
 0x3e8   :  { %967 = vmin.xlane.f32.xlu0 %v2083_v15 }
 0x3eb   :  { %v802_v52 = vpop.xlane.xlu1 %801 }
 0x3ec   :  { %vm819_vm1 = vcmp.eq.f32.partialorder %v1950_v62, %v802_v52  ;;  %v881_v52 = vcvt.s32.f32 %v879_v57 }
 0x3ed   :  { %v2088_v16 = vsel %vm819_vm1, %v1755_v54, 128  ;;  %v804_v17 = vpop.xlane.xlu0 %803 }
 0x3ee   :  { %vm820_vm2 = vcmp.eq.f32.partialorder %v1955_v0, %v804_v17  ;;  %v1034_v21 = vshra.s32 %v2088_v16, 16 }
 0x3ef   :  { %v2093_v22 = vsel %vm820_vm2, %v1755_v54, 128  ;;  %v798_v27 = vpop.xlane.xlu1 %797 }
 0x3f0   :  { %vm817_vm6 = vcmp.eq.f32.partialorder %v1960_v1, %v798_v27  ;;  %v2096_v29 = vcvt.s32.f32 %v1034_v21  ;;  %v1048_v30 = vshra.s32 %v2093_v22, 16  ;;  %v853_v21 = vcvt.s32.f32 %v851_v20 }
 0x3f1   :  { %v2100_v62 = vsel %vm817_vm6, %v1755_v54, 128  ;;  %v800_v32 = vpop.xlane.xlu0 %799 }
 0x3f2   :  { %vm818_vm3 = vcmp.eq.f32.partialorder %v1965_v2, %v800_v32  ;;  %1037 = vmin.xlane.f32.xlu1 %v2096_v29  ;;  %v2104_v0 = vcvt.s32.f32 %v1048_v30  ;;  %v1006_v33 = vshra.s32 %v2100_v62, 16  ;;  %v865_v2 = vand.u32 65535, %v1992_v14 }
 0x3f3   :  { %v2108_v35 = vsel %vm818_vm3, %v1755_v54, 128  ;;  %v2121_v43 = vpop.permute.xlu1 %1143  ;;  %v923_v32 = vcvt.s32.f32 %v921_v26  ;;  %v1047_v26 = vand.u32 65535, %v2093_v22 }
 0x3f4   :  { %1051 = vmin.xlane.f32.xlu0 %v2104_v0  ;;  %v2111_v1 = vcvt.s32.f32 %v1006_v33  ;;  %v1020_v36 = vshra.s32 %v2108_v35, 16  ;;  %v867_v49 = vcvt.s32.f32 %v865_v2 }
 0x3f5   :  { %v2129_v59 = vpop.permute.xlu0 %1139 }
 0x3f6   :  { %1009 = vmin.xlane.f32.xlu1 %v2111_v1  ;;  %v2115_v42 = vcvt.s32.f32 %v1020_v36 }
 0x3f8   :  { %1023 = vmin.xlane.f32.xlu0 %v2115_v42 }
 0x407   :  { %1151 = vbcast.lane.b32.xlu1 %v1851_v19, 360 }
 0x40e   :  { %1147 = vbcast.lane.b32.xlu0 %v1851_v19, 352 }
 0x44f   :  { %v2124_v40 = vpop.xlane.xlu1 %869 }
 0x450   :  { %vm871_vm4 = vcmp.eq.f32.partialorder %v1996_v18, %v2124_v40 }
 0x451   :  { %v872_v55 = vsel %vm871_vm4, %v867_v49, inf  ;;  %v991_v49 = vand.u32 65535, %v2061_v56 }
 0x452   :  { %873 = vmin.xlane.f32.xlu1 %v872_v55  ;;  %v949_v55 = vand.u32 65535, %v2068_v48 }
 0x453   :  { %v2131_v60 = vpop.xlane.xlu1 %841 }
 0x454   :  { %vm843_vm5 = vcmp.eq.f32.partialorder %v2005_v23, %v2131_v60  ;;  %v935_v23 = vand.u32 65535, %v2029_v34  ;;  %v951_v48 = vcvt.s32.f32 %v949_v55 }
 0x455   :  { %v844_v14 = vsel %vm843_vm5, %v839_v61, inf }
 0x456   :  { %845 = vmin.xlane.f32.xlu1 %v844_v14  ;;  %v937_v36 = vcvt.s32.f32 %v935_v23 }
 0x457   :  { %v2136_v13 = vpop.xlane.xlu0 %883 }
 0x458   :  { %vm885_vm7 = vcmp.eq.f32.partialorder %v2015_v25, %v2136_v13  ;;  %v907_v25 = vand.u32 65535, %v2044_v44 }
 0x459   :  { %v886_v18 = vsel %vm885_vm7, %v881_v52, inf }
 0x45a   :  { %887 = vmin.xlane.f32.xlu0 %v886_v18  ;;  %v909_v44 = vcvt.s32.f32 %v907_v25 }
 0x45b   :  { %v2141_v17 = vpop.xlane.xlu0 %855 }
 0x45c   :  { %vm857_vm8 = vcmp.eq.f32.partialorder %v2020_v28, %v2141_v17 }
 0x45d   :  { %v858_v27 = vsel %vm857_vm8, %v853_v21, inf  ;;  %v1005_v21 = vand.u32 65535, %v2100_v62 }
 0x45e   :  { %859 = vmin.xlane.f32.xlu0 %v858_v27 }
 0x45f   :  { %v2147_v30 = vpop.xlane.xlu1 %925  ;;  %v1007_v62 = vcvt.s32.f32 %v1005_v21 }
 0x460   :  { %vm927_vm9 = vcmp.eq.f32.partialorder %v2032_v37, %v2147_v30 }
 0x461   :  { %v2152_v31 = vpop.xlane.xlu0 %939  ;;  %v928_v33 = vsel %vm927_vm9, %v923_v32, inf }
 0x462   :  { %929 = vmin.xlane.f32.xlu1 %v928_v33  ;;  %vm941_vm10 = vcmp.eq.f32.partialorder %v2040_v38, %v2152_v31  ;;  %v977_v38 = vand.u32 65535, %v2056_v47 }
 0x463   :  { %v2156_v28 = vpop.xlane.xlu1 %897  ;;  %v942_v34 = vsel %vm941_vm10, %v937_v36, inf  ;;  %v876_v36 = vcvt.f32.s32 %v2124_v40 }
 0x464   :  { %943 = vmin.xlane.f32.xlu0 %v942_v34  ;;  %vm899_vm11 = vcmp.eq.f32.partialorder %v2047_v39, %v2156_v28  ;;  %v979_v61 = vcvt.s32.f32 %v977_v38  ;;  %v963_v39 = vand.u32 65535, %v2076_v63 }
 0x465   :  { %v2160_v2 = vpop.xlane.xlu0 %911  ;;  %v900_v37 = vsel %vm899_vm11, %v895_v41, inf  ;;  %v848_v41 = vcvt.f32.s32 %v2131_v60 }
 0x466   :  { %901 = vmin.xlane.f32.xlu1 %v900_v37  ;;  %vm913_vm12 = vcmp.eq.f32.partialorder %v2051_v46, %v2160_v2  ;;  %v993_v46 = vcvt.s32.f32 %v991_v49  ;;  %v965_v63 = vcvt.s32.f32 %v963_v39  ;;  %v890_v49 = vcvt.f32.s32 %v2136_v13 }
 0x467   :  { %v914_v45 = vsel %vm913_vm12, %v909_v44, inf  ;;  %v932_v13 = vcvt.f32.s32 %v2147_v30 }
 0x468   :  { %915 = vmin.xlane.f32.xlu0 %v914_v45  ;;  %v891_v40 = vshll.u32 %v890_v49, 16 }
 0x46f   :  { %v2167_v57 = vpop.xlane.xlu1 %981 }
 0x470   :  { %vm983_vm13 = vcmp.eq.f32.partialorder %v2064_v58, %v2167_v57 }
 0x471   :  { %v2172_v14 = vpop.xlane.xlu0 %995  ;;  %v984_v20 = vsel %vm983_vm13, %v979_v61, inf }
 0x472   :  { %985 = vmin.xlane.f32.xlu1 %v984_v20  ;;  %vm997_vm14 = vcmp.eq.f32.partialorder %v2072_v50, %v2172_v14  ;;  %v1033_v50 = vand.u32 65535, %v2088_v16 }
 0x473   :  { %v2176_v47 = vpop.xlane.xlu1 %953  ;;  %v998_v56 = vsel %vm997_vm14, %v993_v46, inf  ;;  %v862_v46 = vcvt.f32.s32 %v2141_v17 }
 0x474   :  { %999 = vmin.xlane.f32.xlu0 %v998_v56  ;;  %vm955_vm15 = vcmp.eq.f32.partialorder %v2079_v51, %v2176_v47  ;;  %v1035_v27 = vcvt.s32.f32 %v1033_v50  ;;  %v1019_v51 = vand.u32 65535, %v2108_v35 }
 0x475   :  { %v2180_v52 = vpop.xlane.xlu0 %967  ;;  %v956_v58 = vsel %vm955_vm15, %v951_v48, inf }
 0x476   :  { %957 = vmin.xlane.f32.xlu1 %v956_v58  ;;  %vm969_vm0 = vcmp.eq.f32.partialorder %v2083_v15, %v2180_v52  ;;  %v1049_v15 = vcvt.s32.f32 %v1047_v26  ;;  %v1021_v35 = vcvt.s32.f32 %v1019_v51  ;;  %v933_v51 = vshll.u32 %v932_v13, 16 }
 0x477   :  { %v970_v18 = vsel %vm969_vm0, %v965_v63, inf }
 0x478   :  { %971 = vmin.xlane.f32.xlu0 %v970_v18  ;;  %v863_v18 = vshll.u32 %v862_v46, 16 }
 0x47f   :  { %v2187_v23 = vpop.xlane.xlu1 %1037 }
 0x480   :  { %vm1039_vm1 = vcmp.eq.f32.partialorder %v2096_v29, %v2187_v23 }
 0x481   :  { %v2192_v24 = vpop.xlane.xlu0 %1051  ;;  %v1040_v32 = vsel %vm1039_vm1, %v1035_v27, inf }
 0x482   :  { %1041 = vmin.xlane.f32.xlu1 %v1040_v32  ;;  %vm1053_vm2 = vcmp.eq.f32.partialorder %v2104_v0, %v2192_v24  ;;  %v904_v32 = vcvt.f32.s32 %v2156_v28 }
 0x483   :  { %v2196_v16 = vpop.xlane.xlu1 %1009  ;;  %v1054_v22 = vsel %vm1053_vm2, %v1049_v15, inf  ;;  %v918_v15 = vcvt.f32.s32 %v2160_v2 }
 0x484   :  { %1055 = vmin.xlane.f32.xlu0 %v1054_v22  ;;  %vm1011_vm6 = vcmp.eq.f32.partialorder %v2111_v1, %v2196_v16  ;;  %v877_v1 = vshll.u32 %v876_v36, 16  ;;  %v905_v36 = vshll.u32 %v904_v32, 16 }
 0x485   :  { %v2200_v25 = vpop.xlane.xlu0 %1023  ;;  %v1012_v29 = vsel %vm1011_vm6, %v1007_v62, inf }
 0x486   :  { %1013 = vmin.xlane.f32.xlu1 %v1012_v29  ;;  %vm1025_vm3 = vcmp.eq.f32.partialorder %v2115_v42, %v2200_v25  ;;  %v849_v42 = vshll.u32 %v848_v41, 16 }
 0x487   :  { %v1026_v33 = vsel %vm1025_vm3, %v1021_v35, inf  ;;  %v2206_v0 = vpop.permute.xlu1 %1151 }
 0x488   :  { %1027 = vmin.xlane.f32.xlu0 %v1026_v33 }
 0x489   :  { %v2210_v45 = vpop.permute.xlu0 %1147 }
 0x497   :  { %1159 = vbcast.lane.b32.xlu1 %v1851_v19, 376 }
 0x49e   :  { %1155 = vbcast.lane.b32.xlu0 %v1851_v19, 368 }
 0x4df   :  { %v874_v34 = vpop.xlane.xlu1 %873 }
 0x4e0   :  { %v875_v37 = vcvt.f32.s32 %v874_v34 }
 0x4e2   :  { %v878_v44 = vadd.s32 %v877_v1, %v875_v37  ;;  %v919_v1 = vshll.u32 %v918_v15, 16  ;;  %v1044_v15 = vcvt.f32.s32 %v2187_v23 }
 0x4e3   :  { %v846_v38 = vpop.xlane.xlu1 %845 }
 0x4e4   :  { %vm1065_vm4 = vcmp.lt.s32.totalorder %v878_v44, 7  ;;  %v847_v55 = vcvt.f32.s32 %v846_v38 }
 0x4e5   :  { %v1066_v61 = vsel %vm1065_vm4, %v878_v44, 7  ;;  %vm1234_vm4 = vcmask 130112  }
 0x4e6   :  { %v850_v19 = vadd.s32 %v849_v42, %v847_v55  ;;  %v1163_v39 = vmul.u32 %v1972_v4, %v1066_v61  ;;  %v946_v4 = vcvt.f32.s32 %v2152_v31 }
 0x4e7   :  { %v888_v20 = vpop.xlane.xlu0 %887 }
 0x4e8   :  { %vm1061_vm5 = vcmp.lt.s32.totalorder %v850_v19, 7  ;;  %v889_v60 = vcvt.f32.s32 %v888_v20  ;;  %1184 = vperm.xlu0 %1527, %v1163_v39   ;;  %v947_v62 = vshll.u32 %v946_v4, 16 }
 0x4e9   :  { %v1062_v56 = vsel %vm1061_vm5, %v850_v19, 7  ;;  %v988_v19 = vcvt.f32.s32 %v2167_v57  ;;  %vm1241_vm5 = vcmask 195712  }
 0x4ea   :  { %v1161_v48 = vmul.u32 %v1970_v3, %v1062_v56  ;;  %v892_v58 = vadd.s32 %v891_v40, %v889_v60  ;;  %v974_v60 = vcvt.f32.s32 %v2180_v52 }
 0x4eb   :  { %v860_v63 = vpop.xlane.xlu0 %859  ;;  %v989_v40 = vshll.u32 %v988_v19, 16 }
 0x4ec   :  { %vm1067_vm7 = vcmp.lt.s32.totalorder %v892_v58, 7  ;;  %v861_v50 = vcvt.f32.s32 %v860_v63  ;;  %1178 = vperm.xlu0 %1527, %v1161_v48   ;;  %v975_v13 = vshll.u32 %v974_v60, 16  ;;  %v1250_v60 = vadd.s32 4294967264, %v1755_v54 }
 0x4ed   :  { %v1068_v26 = vsel %vm1067_vm7, %v892_v58, 7  ;;  %vm1248_vm7 = vcmask 261312  }
 0x4ee   :  { %v864_v21 = vadd.s32 %v863_v18, %v861_v50  ;;  %v1164_v17 = vmul.u32 %v1976_v6, %v1068_v26 }
 0x4ef   :  { %v930_v27 = vpop.xlane.xlu1 %929 }
 0x4f0   :  { %vm1063_vm8 = vcmp.lt.s32.totalorder %v864_v21, 7  ;;  %v931_v3 = vcvt.f32.s32 %v930_v27  ;;  %1187 = vperm.xlu1 %1528, %v1164_v17  }
 0x4f1   :  { %v1064_v22 = vsel %vm1063_vm8, %v864_v21, 7  ;;  %v944_v30 = vpop.xlane.xlu0 %943  ;;  %vm1255_vm8 = vcmask 326912  }
 0x4f2   :  { %v1162_v29 = vmul.u32 %v1974_v5, %v1064_v22  ;;  %v934_v35 = vadd.s32 %v933_v51, %v931_v3  ;;  %v945_v33 = vcvt.f32.s32 %v944_v30  ;;  %v1058_v22 = vcvt.f32.s32 %v2192_v24 }
 0x4f3   :  { %v902_v31 = vpop.xlane.xlu1 %901  ;;  %v1030_v30 = vcvt.f32.s32 %v2200_v25 }
 0x4f4   :  { %vm1073_vm9 = vcmp.lt.s32.totalorder %v934_v35, 7  ;;  %v948_v6 = vadd.s32 %v947_v62, %v945_v33  ;;  %v903_v34 = vcvt.f32.s32 %v902_v31  ;;  %1181 = vperm.xlu1 %1528, %v1162_v29   ;;  %v1045_v33 = vshll.u32 %v1044_v15, 16 }
 0x4f5   :  { %v1074_v28 = vsel %vm1073_vm9, %v934_v35, 7  ;;  %v916_v41 = vpop.xlane.xlu0 %915  ;;  %v1059_v31 = vshll.u32 %v1058_v22, 16  ;;  %vm1262_vm9 = vcmask 392512  }
 0x4f6   :  { %v1167_v37 = vmul.u32 %v1982_v9, %v1074_v28  ;;  %vm1075_vm10 = vcmp.lt.s32.totalorder %v948_v6, 7  ;;  %v906_v2 = vadd.s32 %v905_v36, %v903_v34  ;;  %v917_v44 = vcvt.f32.s32 %v916_v41 }
 0x4f7   :  { %v1076_v38 = vsel %vm1075_vm10, %v948_v6, 7  ;;  %v1002_v9 = vcvt.f32.s32 %v2172_v14  ;;  %vm1269_vm10 = vcmask 458112  }
 0x4f8   :  { %v1168_v42 = vmul.u32 %v1984_v10, %v1076_v38  ;;  %vm1069_vm11 = vcmp.lt.s32.totalorder %v906_v2, 7  ;;  %v920_v5 = vadd.s32 %v919_v1, %v917_v44  ;;  %1196 = vperm.xlu0 %1527, %v1167_v37   ;;  %v960_v10 = vcvt.f32.s32 %v2176_v47 }
 0x4f9   :  { %v1070_v49 = vsel %vm1069_vm11, %v906_v2, 7  ;;  %vm1276_vm11 = vcmask 523712  }
 0x4fa   :  { %v1165_v55 = vmul.u32 %v1978_v7, %v1070_v49  ;;  %vm1071_vm12 = vcmp.lt.s32.totalorder %v920_v5, 7  ;;  %1199 = vperm.xlu1 %1528, %v1168_v42   ;;  %v1003_v7 = vshll.u32 %v1002_v9, 16  ;;  %v961_v18 = vshll.u32 %v960_v10, 16 }
 0x4fb   :  { %v1072_v61 = vsel %vm1071_vm12, %v920_v5, 7  ;;  %vm1283_vm12 = vcmask 589312  }
 0x4fc   :  { %v1166_v39 = vmul.u32 %v1980_v8, %v1072_v61  ;;  %1190 = vperm.xlu0 %1527, %v1165_v55  }
 0x4fe   :  { %1193 = vperm.xlu1 %1528, %v1166_v39   ;;  %v2242_v39 = vshrl.u32 %v63_v53, 7 }
 0x4ff   :  { %v986_v20 = vpop.xlane.xlu1 %985 }
 0x500   :  { %v987_v46 = vcvt.f32.s32 %v986_v20  ;;  %v1227_v10 = vsub.s32 %v1755_v54, %v2242_v39 }
 0x501   :  { %v1000_v56 = vpop.xlane.xlu0 %999 }
 0x502   :  { %v990_v48 = vadd.s32 %v989_v40, %v987_v46  ;;  %v1001_v58 = vcvt.f32.s32 %v1000_v56  ;;  %v1243_v56 = vadd.s32 4294967272, %v1755_v54 }
 0x503   :  { %v958_v63 = vpop.xlane.xlu1 %957 }
 0x504   :  { %vm1081_vm13 = vcmp.lt.s32.totalorder %v990_v48, 7  ;;  %v1004_v57 = vadd.s32 %v1003_v7, %v1001_v58  ;;  %v959_v8 = vcvt.f32.s32 %v958_v63  ;;  %v1257_v63 = vadd.s32 4294967256, %v1755_v54 }
 0x505   :  { %v1082_v50 = vsel %vm1081_vm13, %v990_v48, 7  ;;  %v972_v14 = vpop.xlane.xlu0 %971  ;;  %vm1290_vm13 = vcmask 654912  }
 0x506   :  { %v1171_v26 = vmul.u32 %v2129_v59, %v1082_v50  ;;  %vm1083_vm14 = vcmp.lt.s32.totalorder %v1004_v57, 7  ;;  %v962_v4 = vadd.s32 %v961_v18, %v959_v8  ;;  %v973_v47 = vcvt.f32.s32 %v972_v14 }
 0x507   :  { %v1084_v21 = vsel %vm1083_vm14, %v1004_v57, 7  ;;  %v1253_v18 = vsub.s32 %v1250_v60, %v2242_v39  ;;  %v1246_v57 = vsub.s32 %v1243_v56, %v2242_v39  ;;  %v1260_v14 = vsub.s32 %v1257_v63, %v2242_v39 }
 0x508   :  { %v1172_v52 = vmul.u32 %v2121_v43, %v1084_v21  ;;  %vm1077_vm15 = vcmp.lt.s32.totalorder %v962_v4, 7  ;;  %v976_v17 = vadd.s32 %v975_v13, %v973_v47  ;;  %1208 = vperm.xlu0 %1527, %v1171_v26   ;;  %v1016_v43 = vcvt.f32.s32 %v2196_v16 }
 0x509   :  { %v1078_v27 = vsel %vm1077_vm15, %v962_v4, 7  ;;  %v1264_v4 = vadd.s32 4294967248, %v1755_v54  ;;  %vm1297_vm14 = vcmask 720512   ;;  %vm1304_vm15 = vcmask 786112  }
 0x50a   :  { %v1169_v51 = vmul.u32 %v1986_v11, %v1078_v27  ;;  %vm1079_vm0 = vcmp.lt.s32.totalorder %v976_v17, 7  ;;  %1211 = vperm.xlu1 %1528, %v1172_v52   ;;  %v1017_v36 = vshll.u32 %v1016_v43, 16  ;;  %v1278_v27 = vadd.s32 4294967232, %v1755_v54 }
 0x50b   :  { %v1080_v32 = vsel %vm1079_vm0, %v976_v17, 7  ;;  %v1285_v43 = vadd.s32 4294967224, %v1755_v54  ;;  %vm1311_vm0 = vcmask 851712  }
 0x50c   :  { %v1170_v3 = vmul.u32 %v1988_v12, %v1080_v32  ;;  %1202 = vperm.xlu0 %1527, %v1169_v51   ;;  %v1031_v12 = vshll.u32 %v1030_v30, 16  ;;  %v1271_v51 = vadd.s32 4294967240, %v1755_v54  ;;  %v1281_v30 = vsub.s32 %v1278_v27, %v2242_v39 }
 0x50e   :  { %1205 = vperm.xlu1 %1528, %v1170_v3  }
 0x50f   :  { %v1042_v59 = vpop.xlane.xlu1 %1041 }
 0x510   :  { %v1043_v29 = vcvt.f32.s32 %v1042_v59  ;;  %v1267_v59 = vsub.s32 %v1264_v4, %v2242_v39 }
 0x511   :  { %v1056_v62 = vpop.xlane.xlu0 %1055 }
 0x512   :  { %v1057_v35 = vcvt.f32.s32 %v1056_v62  ;;  %v1046_v1 = vadd.s32 %v1045_v33, %v1043_v29  ;;  %v1274_v62 = vsub.s32 %v1271_v51, %v2242_v39  ;;  %v1288_v33 = vsub.s32 %v1285_v43, %v2242_v39 }
 0x513   :  { %v1014_v11 = vpop.xlane.xlu1 %1013 }
 0x514   :  { %v1015_v6 = vcvt.f32.s32 %v1014_v11  ;;  %v1060_v28 = vadd.s32 %v1059_v31, %v1057_v35  ;;  %vm1089_vm3 = vcmp.lt.s32.totalorder %v1046_v1, 7 }
 0x515   :  { %v1028_v34 = vpop.xlane.xlu0 %1027  ;;  %v1090_v5 = vsel %vm1089_vm3, %v1046_v1, 7  ;;  %v1299_v1 = vadd.s32 4294967208, %v1755_v54 }
 0x516   :  { %v1018_v41 = vadd.s32 %v1017_v36, %v1015_v6  ;;  %v1029_v23 = vcvt.f32.s32 %v1028_v34  ;;  %vm1091_vm6 = vcmp.lt.s32.totalorder %v1060_v28, 7  ;;  %v1292_v36 = vadd.s32 4294967216, %v1755_v54 }
 0x517   :  { %v1160_v38 = vpop.permute.xlu1 %1159  ;;  %v1092_v42 = vsel %vm1091_vm6, %v1060_v28, 7  ;;  %vm1332_vm6 = vcmask 1048512  }
 0x518   :  { %vm1085_vm1 = vcmp.lt.s32.totalorder %v1018_v41, 7  ;;  %v1032_v24 = vadd.s32 %v1031_v12, %v1029_v23  ;;  %v1176_v55 = vmul.u32 %v1160_v38, %v1092_v42  ;;  %v1295_v23 = vsub.s32 %v1292_v36, %v2242_v39 }
 0x519   :  { %v1086_v37 = vsel %vm1085_vm1, %v1018_v41, 7  ;;  %v1156_v2 = vpop.permute.xlu0 %1155  ;;  %v1320_v42 = vadd.s32 4294967184, %v1755_v54  ;;  %vm1318_vm1 = vcmask 917312  }
 0x51a   :  { %v1173_v16 = vmul.u32 %v2210_v45, %v1086_v37  ;;  %vm1087_vm2 = vcmp.lt.s32.totalorder %v1032_v24, 7  ;;  %v1175_v49 = vmul.u32 %v1156_v2, %v1090_v5  ;;  %v1229_v45 = vadd.s32 4294967288, %v1755_v54 }
 0x51b   :  { %v1088_v25 = vsel %vm1087_vm2, %v1032_v24, 7  ;;  %v1306_v37 = vadd.s32 4294967200, %v1755_v54  ;;  %vm1325_vm2 = vcmask 982912  }
 0x51c   :  { %v1174_v44 = vmul.u32 %v2206_v0, %v1088_v25  ;;  %1214 = vperm.xlu0 %1527, %v1173_v16   ;;  %v1232_v20 = vsub.s32 %v1229_v45, %v2242_v39  ;;  %v1236_v0 = vadd.s32 4294967280, %v1755_v54  ;;  %v1313_v16 = vadd.s32 4294967192, %v1755_v54 }
 0x51d   :  { %v1302_v25 = vsub.s32 %v1299_v1, %v2242_v39  ;;  %v1309_v38 = vsub.s32 %v1306_v37, %v2242_v39 }
 0x51e   :  { %1217 = vperm.xlu1 %1528, %v1174_v44   ;;  %v1239_v48 = vsub.s32 %v1236_v0, %v2242_v39 }
 0x520   :  { %1220 = vperm.xlu0 %1527, %v1175_v49   ;;  %v1316_v49 = vsub.s32 %v1313_v16, %v2242_v39 }
 0x522   :  { %1223 = vperm.xlu1 %1528, %v1176_v55   ;;  %v1327_v55 = vadd.s32 4294967176, %v1755_v54 }
 0x567   :  { %v1185_v61 = vpop.permute.xlu0 %1184 }
 0x568   :  { %v1240_v50 = vrot.slane %v1185_v61, %v1239_v48 }
 0x56b   :  { %v1179_v9 = vpop.permute.xlu0 %1178 }
 0x56c   :  { %v1228_v58 = vrot.slane %v1179_v9, %v1227_v10  ;;  %v1323_v9 = vsub.s32 %v1320_v42, %v2242_v39 }
 0x56f   :  { %v1188_v19 = vpop.permute.xlu1 %1187 }
 0x570   :  { %v1247_v52 = vrot.slane %v1188_v19, %v1246_v57 }
 0x573   :  { %v1182_v40 = vpop.permute.xlu1 %1181 }
 0x574   :  { %v1233_v7 = vrot.slane %v1182_v40, %v1232_v20 }
 0x576   :  { %v1235_v8 = vsel %vm1234_vm4, %v1233_v7, %v1228_v58 }
 0x577   :  { %v1197_v46 = vpop.permute.xlu0 %1196  ;;  %v1242_v26 = vsel %vm1241_vm5, %v1240_v50, %v1235_v8 }
 0x578   :  { %v1249_v32 = vsel %vm1248_vm7, %v1247_v52, %v1242_v26  ;;  %v1268_v11 = vrot.slane %v1197_v46, %v1267_v59  ;;  %v1330_v46 = vsub.s32 %v1327_v55, %v2242_v39 }
 0x579   :  { %v1200_v53 = vpop.permute.xlu1 %1199 }
 0x57a   :  { %v1275_v34 = vrot.slane %v1200_v53, %v1274_v62 }
 0x57b   :  { %v1191_v13 = vpop.permute.xlu0 %1190 }
 0x57c   :  { %v1254_v47 = vrot.slane %v1191_v13, %v1253_v18 }
 0x57d   :  { %v1194_v21 = vpop.permute.xlu1 %1193 }
 0x57e   :  { %v1261_v3 = vrot.slane %v1194_v21, %v1260_v14  ;;  %v1256_v15 = vsel %vm1255_vm8, %v1254_v47, %v1249_v32 }
 0x580   :  { %v1263_v29 = vsel %vm1262_vm9, %v1261_v3, %v1256_v15 }
 0x581   :  { %v1270_v31 = vsel %vm1269_vm10, %v1268_v11, %v1263_v29 }
 0x582   :  { %v1277_v28 = vsel %vm1276_vm11, %v1275_v34, %v1270_v31 }
 0x587   :  { %v1209_v17 = vpop.permute.xlu0 %1208 }
 0x588   :  { %v1296_v44 = vrot.slane %v1209_v17, %v1295_v23 }
 0x589   :  { %v1212_v22 = vpop.permute.xlu1 %1211 }
 0x58a   :  { %v1303_v61 = vrot.slane %v1212_v22, %v1302_v25 }
 0x58b   :  { %v1203_v35 = vpop.permute.xlu0 %1202 }
 0x58c   :  { %v1282_v6 = vrot.slane %v1203_v35, %v1281_v30 }
 0x58d   :  { %v1206_v12 = vpop.permute.xlu1 %1205 }
 0x58e   :  { %v1289_v41 = vrot.slane %v1206_v12, %v1288_v33  ;;  %v1284_v24 = vsel %vm1283_vm12, %v1282_v6, %v1277_v28 }
 0x590   :  { %v1291_v2 = vsel %vm1290_vm13, %v1289_v41, %v1284_v24 }
 0x591   :  { %v1298_v5 = vsel %vm1297_vm14, %v1296_v44, %v1291_v2 }
 0x592   :  { %v1305_v20 = vsel %vm1304_vm15, %v1303_v61, %v1298_v5 }
 0x59b   :  { %v1215_v19 = vpop.permute.xlu0 %1214 }
 0x59c   :  { %v1310_v45 = vrot.slane %v1215_v19, %v1309_v38 }
 0x59d   :  { %v1218_v0 = vpop.permute.xlu1 %1217 }
 0x59e   :  { %v1312_v40 = vsel %vm1311_vm0, %v1310_v45, %v1305_v20  ;;  %v1317_v10 = vrot.slane %v1218_v0, %v1316_v49 }
 0x59f   :  { %v1221_v60 = vpop.permute.xlu0 %1220 }
 0x5a0   :  { %v1319_v56 = vsel %vm1318_vm1, %v1317_v10, %v1312_v40  ;;  %v1324_v7 = vrot.slane %v1221_v60, %v1323_v9 }
 0x5a1   :  { %v1224_v54 = vpop.permute.xlu1 %1223 }
 0x5a2   :  { %v1331_v48 = vrot.slane %v1224_v54, %v1330_v46  ;;  %v1326_v53 = vsel %vm1325_vm2, %v1324_v7, %v1319_v56 }
 0x5a4   :  { %v1333_v58 = vsel %vm1332_vm6, %v1331_v48, %v1326_v53 }
 0x5a5   :  { %1334 = vst [vmem:[#allocation2] sm:$0x1] %v1333_v58 }
 0x5a6   :  { %1585 = shalt.err (!%p1582_p4)
}
 0x5a7   :  { %s1586_s0 = scalar_lea.hbm %s2295_s8, 16 }
 0x5a8   :  { %p1587_p5 = scmp.ne.s32.totalorder %s2295_s8, %s1586_s0  ;;  %p1590_p6 = scmp.lt.u32.totalorder %s1586_s0, %s2295_s8 }
 0x5aa   :  { %p1592_p7 = pnand %p1590_p6, %p1587_p5 }
 0x5ac   :  { %1595 = shalt.err (!%p1592_p7)
}
 0x5ad   :  { %1344 = dma.vmem_to_hbm [thread:$0]  %s1342_s26, 16, %s2295_s8, [#allocation3]  }
 0x5ae   :  { %1596 = dma.done.wait [#allocation3], 16  }
 0x5af   :  { %1597 = vsyncadd [#allocation3], 4294967280 }
 0x5b0   :  { %1348 = vsyncpa [#allocation3], 1 }

</bundles_post_ra>
